<compile_context>
chip_gen: v7x
topology: tpu7x:2x2x1
jax: 0.10.0
libtpu: 0.0.40
codegen_flags: <defaults>
</compile_context>

<pallas_src>
import jax
import jax.numpy as jnp
import numpy as np
from jax.experimental import pallas as pl
from jax.experimental.pallas import tpu as pltpu


# ----------------------------------------------------------------------------
# Pallas kernel: one grid step == TT LSTM time steps (sequential recurrence)
# ----------------------------------------------------------------------------
def _lstm_attn_kernel(xproj_ref, oh_ref, wrec_ref, wwin_ref, bwin_ref,
                      out_ref, h_sc, c_sc, kappa_sc, win_sc):
    blk = pl.program_id(0)

    @pl.when(blk == 0)
    def _():
        # re_init: zero hidden state, cell state, kappa and attention window
        h_sc[...] = jnp.zeros_like(h_sc)
        c_sc[...] = jnp.zeros_like(c_sc)
        kappa_sc[...] = jnp.zeros_like(kappa_sc)
        win_sc[...] = jnp.zeros_like(win_sc)

    TT = xproj_ref.shape[0]
    B, H = h_sc.shape
    K = kappa_sc.shape[-1]
    C = win_sc.shape[-1]
    U = oh_ref.shape[1]
    P = out_ref.shape[-1]
    pad = P - (H + C + U)

    # Resident constants (hoisted out of the inner loop).
    oh = oh_ref[...]                        # (B, U, C)  one-hot * mask
    wrec = wrec_ref[...]                    # (C+H, 4H)  fused [Ww^T; Wh^T]
    wwin = wwin_ref[...]                    # (H, 3K)
    bwin = bwin_ref[...]                    # (1, 3K)
    u_pos = jax.lax.broadcasted_iota(jnp.int32, (1, 1, U), 2).astype(jnp.float32)
    zeros_pad = jnp.zeros((B, pad), jnp.float32)

    def step(s, carry):
        h, c, kappa, win = carry

        # Gates: precomputed x-projection + ONE fused recurrent matmul.
        xg = xproj_ref[s]                                      # (B, 4H)
        rec_in = jnp.concatenate([win, h], axis=-1)            # (B, C+H)
        gates = xg + jnp.dot(rec_in, wrec,
                             preferred_element_type=jnp.float32)  # (B, 4H)
        i_g = jax.nn.sigmoid(gates[:, 0:H])
        f_g = jax.nn.sigmoid(gates[:, H:2 * H])
        g_g = jnp.tanh(gates[:, 2 * H:3 * H])
        o_g = jax.nn.sigmoid(gates[:, 3 * H:4 * H])
        c_new = f_g * c + i_g * g_g
        h_new = o_g * jnp.tanh(c_new)

        # window_layer: (B, 3K) -> alpha, beta, kappa
        wp = jnp.dot(h_new, wwin, preferred_element_type=jnp.float32) + bwin
        alpha = jnp.exp(wp[:, 0:K])
        beta = jnp.exp(wp[:, K:2 * K])
        kappa_new = kappa + jnp.exp(wp[:, 2 * K:3 * K])

        # phi[b, u] = sum_k alpha * exp(-beta * (kappa - u)^2)
        diff = kappa_new[:, :, None] - u_pos                   # (B, K, U)
        phi = jnp.sum(alpha[:, :, None]
                      * jnp.exp(-beta[:, :, None] * diff * diff),
                      axis=1)                                  # (B, U)

        # window[b, c] = sum_u phi[b, u] * (one_hot * mask)[b, u, c]  (MXU)
        window = jnp.einsum('bqu,buc->bqc', phi[:, None, :], oh,
                            preferred_element_type=jnp.float32)[:, 0, :]  # (B, C)

        # Lane-dense packed store: [h | window | phi | zero-pad] -> 128 lanes.
        parts = [h_new, window, phi]
        if pad > 0:
            parts.append(zeros_pad)
        out_ref[s] = jnp.concatenate(parts, axis=-1)           # (B, P)

        return h_new, c_new, kappa_new, window

    carry0 = (h_sc[...], c_sc[...], kappa_sc[...], win_sc[...])
    h_f, c_f, k_f, w_f = jax.lax.fori_loop(0, TT, step, carry0, unroll=True)

    # Persist recurrent state for the next grid step.
    h_sc[...] = h_f
    c_sc[...] = c_f
    kappa_sc[...] = k_f
    win_sc[...] = w_f


# ----------------------------------------------------------------------------
# Wrapper
# ----------------------------------------------------------------------------
def lstm_with_gaussian_attention(strokes, sentences, sentences_mask, params,
                                 hidden_dim, num_gaussian_window, num_chars,
                                 timesteps_per_block=8):
    B, T, D = strokes.shape
    U = sentences.shape[-1]
    H = hidden_dim
    K = num_gaussian_window
    C = num_chars

    # ---- glue: parameter reshuffle ----
    w_ih = params["weight_ih"]                                # (4H, D + C)
    wx_T = jnp.transpose(w_ih[:, :D])                         # (D, 4H)
    ww_T = jnp.transpose(w_ih[:, D:])                         # (C, 4H)
    wh_T = jnp.transpose(params["weight_hh"])                 # (H, 4H)
    b = (params["bias_ih"] + params["bias_hh"])[None, :]      # (1, 4H)
    wwin_T = jnp.transpose(params["win_weight"])              # (H, 3K)
    bwin = params["win_bias"][None, :]                        # (1, 3K)

    # Fused recurrent weight: [window ; h] @ wrec == window@Ww^T + h@Wh^T
    wrec = jnp.concatenate([ww_T, wh_T], axis=0)              # (C+H, 4H)

    # Precompute the input projection for all timesteps (one big matmul,
    # removes one MXU op + bias broadcast from the sequential critical path).
    xproj = (jnp.dot(strokes.reshape(B * T, D), wx_T,
                     precision=jax.lax.Precision.HIGHEST) + b)      # (B*T, 4H)
    xproj = jnp.transpose(xproj.reshape(B, T, 4 * H), (1, 0, 2))    # (T, B, 4H)

    # One-hot * mask encoding of the character sequence (constant per call).
    onehot_masked = (jax.nn.one_hot(sentences, C, dtype=jnp.float32)
                     * sentences_mask[:, :, None].astype(jnp.float32))  # (B,U,C)

    # Multi-timestep blocking (pad T to a multiple of TT; padded steps are
    # computed with zero inputs and sliced away afterwards).
    TT = max(1, min(timesteps_per_block, T))
    T_pad = ((T + TT - 1) // TT) * TT
    if T_pad != T:
        xproj = jnp.pad(xproj, ((0, T_pad - T), (0, 0), (0, 0)))

    # Lane-dense packed output slab: [h | window | phi] padded to 128 lanes.
    P = ((H + C + U + 127) // 128) * 128

    grid_spec = pltpu.PrefetchScalarGridSpec(
        num_scalar_prefetch=0,
        grid=(T_pad // TT,),
        in_specs=[
            pl.BlockSpec((TT, B, 4 * H), lambda i: (i, 0, 0)),   # x projection
            pl.BlockSpec((B, U, C), lambda i: (0, 0, 0)),        # one-hot*mask
            pl.BlockSpec((C + H, 4 * H), lambda i: (0, 0)),      # fused rec W^T
            pl.BlockSpec((H, 3 * K), lambda i: (0, 0)),          # window W^T
            pl.BlockSpec((1, 3 * K), lambda i: (0, 0)),          # window bias
        ],
        out_specs=pl.BlockSpec((TT, B, P), lambda i: (i, 0, 0)),  # packed slab
        scratch_shapes=[
            pltpu.VMEM((B, H), jnp.float32),   # h
            pltpu.VMEM((B, H), jnp.float32),   # c
            pltpu.VMEM((B, K), jnp.float32),   # kappa
            pltpu.VMEM((B, C), jnp.float32),   # window
        ],
    )

    packed = pl.pallas_call(
        _lstm_attn_kernel,
        out_shape=jax.ShapeDtypeStruct((T_pad, B, P), jnp.float32),
        grid_spec=grid_spec,
        compiler_params=pltpu.CompilerParams(
            dimension_semantics=("arbitrary",)),   # sequential recurrence
    )(xproj, onehot_masked, wrec, wwin_T, bwin)

    # Unpack: back to PyTorch batch-first convention and split the slab.
    packed = jnp.transpose(packed[:T], (1, 0, 2))               # (B, T, P)
    h_seq = packed[..., 0:H]
    win_seq = packed[..., H:H + C]
    phi_seq = packed[..., H + C:H + C + U]
    return h_seq, win_seq, phi_seq


# ----------------------------------------------------------------------------
# Pure-JAX reference (mirrors the PyTorch forward exactly)
# ----------------------------------------------------------------------------
def reference(strokes, sentences, sentences_mask, params, H, K, C):
    B, T, D = strokes.shape
    U = sentences.shape[-1]
    w_ih = params["weight_ih"]
    wx_T, ww_T = jnp.transpose(w_ih[:, :D]), jnp.transpose(w_ih[:, D:])
    wh_T = jnp.transpose(params["weight_hh"])
    b = params["bias_ih"] + params["bias_hh"]
    wwin_T = jnp.transpose(params["win_weight"])
    bwin = params["win_bias"]
    oh = (jax.nn.one_hot(sentences, C, dtype=jnp.float32)
          * sentences_mask[:, :, None].astype(jnp.float32))
    u = jnp.arange(U, dtype=jnp.float32)[None, None, :]
    hp = jax.lax.Precision.HIGHEST

    h = jnp.zeros((B, H)); c = jnp.zeros((B, H))
    kappa = jnp.zeros((B, K)); win = jnp.zeros((B, C))
    hs, ws, ps = [], [], []
    for t in range(T):
        x = strokes[:, t, :]
        gates = (jnp.dot(x, wx_T, precision=hp) + jnp.dot(win, ww_T, precision=hp)
                 + jnp.dot(h, wh_T, precision=hp) + b)
        i = jax.nn.sigmoid(gates[:, 0:H]); f = jax.nn.sigmoid(gates[:, H:2 * H])
        g = jnp.tanh(gates[:, 2 * H:3 * H]); o = jax.nn.sigmoid(gates[:, 3 * H:4 * H])
        c = f * c + i * g
        h = o * jnp.tanh(c)
        wp = jnp.dot(h, wwin_T, precision=hp) + bwin
        alpha = jnp.exp(wp[:, :K]); beta = jnp.exp(wp[:, K:2 * K])
        kappa = kappa + jnp.exp(wp[:, 2 * K:])
        phi = jnp.sum(alpha[:, :, None]
                      * jnp.exp(-beta[:, :, None] * (kappa[:, :, None] - u) ** 2),
                      axis=1)
        win = jnp.sum(phi[:, :, None] * oh, axis=1)
        hs.append(h); ws.append(win); ps.append(phi)
    return jnp.stack(hs, 1), jnp.stack(ws, 1), jnp.stack(ps, 1)


# ----------------------------------------------------------------------------
# Main
# ----------------------------------------------------------------------------
if __name__ == "__main__":
    # small shapes consistent with the module
    B, T = 2, 10           # batch, strokes seq len (T=10 also exercises padding)
    D = 3                  # input_dim (x, y, eos)
    H = 32                 # hidden_dim
    K = 4                  # num_gaussian_window
    C = 16                 # num_chars
    U = 12                 # char seq len

    key = jax.random.PRNGKey(0)
    ks = jax.random.split(key, 8)
    lim = 1.0 / np.sqrt(H)   # PyTorch-style uniform init (deterministic)
    params = {
        "weight_ih": jax.random.uniform(ks[0], (4 * H, D + C), jnp.float32, -lim, lim),
        "weight_hh": jax.random.uniform(ks[1], (4 * H, H), jnp.float32, -lim, lim),
        "bias_ih":   jax.random.uniform(ks[2], (4 * H,), jnp.float32, -lim, lim),
        "bias_hh":   jax.random.uniform(ks[3], (4 * H,), jnp.float32, -lim, lim),
        "win_weight": jax.random.uniform(ks[4], (3 * K, H), jnp.float32, -lim, lim),
        "win_bias":   jax.random.uniform(ks[5], (3 * K,), jnp.float32, -lim, lim),
    }

    strokes = jax.random.normal(ks[6], (B, T, D), jnp.float32) * 0.5
    sentences = jax.random.randint(ks[7], (B, U), 0, C, dtype=jnp.int32)
    # batch 0: full sentence, batch 1: 9 valid chars
    sentences_mask = (jnp.arange(U)[None, :] < jnp.array([[U], [9]])).astype(jnp.float32)

    fn = jax.jit(lambda s, sen, m: lstm_with_gaussian_attention(
        s, sen, m, params, H, K, C, timesteps_per_block=4))
    h_seq, win_seq, phi_seq = fn(strokes, sentences, sentences_mask)
    jax.block_until_ready((h_seq, win_seq, phi_seq))

    h_ref, win_ref, phi_ref = reference(strokes, sentences, sentences_mask,
                                        params, H, K, C)
    np.testing.assert_allclose(np.asarray(h_seq), np.asarray(h_ref),
                               rtol=1e-2, atol=1e-2)
    np.testing.assert_allclose(np.asarray(win_seq), np.asarray(win_ref),
                               rtol=1e-2, atol=1e-2)
    np.testing.assert_allclose(np.asarray(phi_seq), np.asarray(phi_ref),
                               rtol=1e-2, atol=1e-2)

    assert h_seq.shape == (B, T, H)
    assert win_seq.shape == (B, T, C)
    assert phi_seq.shape == (B, T, U)
    print("KERNEL_OK")
</pallas_src>

<mosaic_0001>
module attributes {stable_mosaic.version = 11 : i64} {
  func.func @_lstm_attn_kernel(%arg0: i32, %arg1: memref<4x2x128xf32, #tpu.memory_space<vmem>>, %arg2: memref<2x12x16xf32, #tpu.memory_space<vmem>>, %arg3: memref<48x128xf32, #tpu.memory_space<vmem>>, %arg4: memref<32x12xf32, #tpu.memory_space<vmem>>, %arg5: memref<1x12xf32, #tpu.memory_space<vmem>>, %arg6: memref<4x2x128xf32, #tpu.memory_space<vmem>>, %arg7: memref<2x32xf32, #tpu.memory_space<vmem>>, %arg8: memref<2x32xf32, #tpu.memory_space<vmem>>, %arg9: memref<2x4xf32, #tpu.memory_space<vmem>>, %arg10: memref<2x16xf32, #tpu.memory_space<vmem>>) attributes {dimension_semantics = [#tpu.dimension_semantics<arbitrary>], iteration_bounds = array<i64: 3>, scalar_prefetch = 0 : i64, scratch_operands = 4 : i64, tpu.core_type = #tpu.core_type<tc>, window_params = [{transform_indices = @transform_0, window_bounds = array<i64: 4, 2, 128>}, {pipeline_mode = #tpu.pipeline_mode<synchronous>, transform_indices = @transform_1, window_bounds = array<i64: 2, 12, 16>}, {pipeline_mode = #tpu.pipeline_mode<synchronous>, transform_indices = @transform_2, window_bounds = array<i64: 48, 128>}, {pipeline_mode = #tpu.pipeline_mode<synchronous>, transform_indices = @transform_3, window_bounds = array<i64: 32, 12>}, {pipeline_mode = #tpu.pipeline_mode<synchronous>, transform_indices = @transform_4, window_bounds = array<i64: 1, 12>}, {transform_indices = @transform_5, window_bounds = array<i64: 4, 2, 128>}]} {
    %c0_i32 = arith.constant 0 : i32
    %0 = arith.cmpi eq, %arg0, %c0_i32 : i32
    %1 = arith.extui %0 : i1 to i32
    %c0_i32_0 = arith.constant 0 : i32
    %2 = arith.cmpi ne, %1, %c0_i32_0 : i32
    scf.if %2 {
      %cst_74 = arith.constant 0.000000e+00 : f32
      %274 = vector.broadcast %cst_74 : f32 to vector<2x32xf32>
      %c0_75 = arith.constant 0 : index
      %c0_76 = arith.constant 0 : index
      %275 = vector.load %arg7[%c0_75, %c0_76] : memref<2x32xf32, #tpu.memory_space<vmem>>, vector<2x32xf32>
      tpu.vector_store %arg7[%c0_75, %c0_76], %274 {strides = array<i32>} : memref<2x32xf32, #tpu.memory_space<vmem>>, vector<2x32xf32>,
      %cst_77 = arith.constant 0.000000e+00 : f32
      %276 = vector.broadcast %cst_77 : f32 to vector<2x32xf32>
      %c0_78 = arith.constant 0 : index
      %c0_79 = arith.constant 0 : index
      %277 = vector.load %arg8[%c0_78, %c0_79] : memref<2x32xf32, #tpu.memory_space<vmem>>, vector<2x32xf32>
      tpu.vector_store %arg8[%c0_78, %c0_79], %276 {strides = array<i32>} : memref<2x32xf32, #tpu.memory_space<vmem>>, vector<2x32xf32>,
      %cst_80 = arith.constant 0.000000e+00 : f32
      %278 = vector.broadcast %cst_80 : f32 to vector<2x4xf32>
      %c0_81 = arith.constant 0 : index
      %c0_82 = arith.constant 0 : index
      %279 = vector.load %arg9[%c0_81, %c0_82] : memref<2x4xf32, #tpu.memory_space<vmem>>, vector<2x4xf32>
      tpu.vector_store %arg9[%c0_81, %c0_82], %278 {strides = array<i32>} : memref<2x4xf32, #tpu.memory_space<vmem>>, vector<2x4xf32>,
      %cst_83 = arith.constant 0.000000e+00 : f32
      %280 = vector.broadcast %cst_83 : f32 to vector<2x16xf32>
      %c0_84 = arith.constant 0 : index
      %c0_85 = arith.constant 0 : index
      %281 = vector.load %arg10[%c0_84, %c0_85] : memref<2x16xf32, #tpu.memory_space<vmem>>, vector<2x16xf32>
      tpu.vector_store %arg10[%c0_84, %c0_85], %280 {strides = array<i32>} : memref<2x16xf32, #tpu.memory_space<vmem>>, vector<2x16xf32>,
    } else {
    }
    %c0 = arith.constant 0 : index
    %c0_1 = arith.constant 0 : index
    %c0_2 = arith.constant 0 : index
    %3 = vector.load %arg2[%c0, %c0_1, %c0_2] : memref<2x12x16xf32, #tpu.memory_space<vmem>>, vector<2x12x16xf32>
    %c0_3 = arith.constant 0 : index
    %c0_4 = arith.constant 0 : index
    %4 = vector.load %arg3[%c0_3, %c0_4] : memref<48x128xf32, #tpu.memory_space<vmem>>, vector<48x128xf32>
    %c0_5 = arith.constant 0 : index
    %c0_6 = arith.constant 0 : index
    %5 = vector.load %arg4[%c0_5, %c0_6] : memref<32x12xf32, #tpu.memory_space<vmem>>, vector<32x12xf32>
    %c0_7 = arith.constant 0 : index
    %c0_8 = arith.constant 0 : index
    %6 = vector.load %arg5[%c0_7, %c0_8] : memref<1x12xf32, #tpu.memory_space<vmem>>, vector<1x12xf32>
    %7 = tpu.iota {dimensions = array<i32: 2>} : vector<1x1x12xi32>
    %8 = arith.sitofp %7 : vector<1x1x12xi32> to vector<1x1x12xf32>
    %cst = arith.constant 0.000000e+00 : f32
    %9 = vector.broadcast %cst : f32 to vector<2x68xf32>
    %c0_9 = arith.constant 0 : index
    %c0_10 = arith.constant 0 : index
    %10 = vector.load %arg7[%c0_9, %c0_10] : memref<2x32xf32, #tpu.memory_space<vmem>>, vector<2x32xf32>
    %c0_11 = arith.constant 0 : index
    %c0_12 = arith.constant 0 : index
    %11 = vector.load %arg8[%c0_11, %c0_12] : memref<2x32xf32, #tpu.memory_space<vmem>>, vector<2x32xf32>
    %c0_13 = arith.constant 0 : index
    %c0_14 = arith.constant 0 : index
    %12 = vector.load %arg9[%c0_13, %c0_14] : memref<2x4xf32, #tpu.memory_space<vmem>>, vector<2x4xf32>
    %c0_15 = arith.constant 0 : index
    %c0_16 = arith.constant 0 : index
    %13 = vector.load %arg10[%c0_15, %c0_16] : memref<2x16xf32, #tpu.memory_space<vmem>>, vector<2x16xf32>
    %c0_i32_17 = arith.constant 0 : i32
    %14 = arith.index_cast %c0_i32_17 : i32 to index
    %c0_18 = arith.constant 0 : index
    %c0_19 = arith.constant 0 : index
    %15 = vector.load %arg1[%14, %c0_18, %c0_19] : memref<4x2x128xf32, #tpu.memory_space<vmem>>, vector<1x2x128xf32>
    %16 = vector.shape_cast %15 : vector<1x2x128xf32> to vector<2x128xf32>
    %17 = tpu.concatenate %13, %10 in 1 : vector<2x16xf32>, vector<2x32xf32> -> vector<2x48xf32>
    %cst_20 = arith.constant dense<0.000000e+00> : vector<2x128xf32>
    %18 = tpu.matmul %17, %4, %cst_20 {dimension_numbers = #tpu.dot_dimension_numbers<[1], [0], [0], [1], [0, 0, 1, 1], [], []>} : vector<2x48xf32>, vector<48x128xf32>, vector<2x128xf32> -> vector<2x128xf32>
    %19 = arith.addf %16, %18 : vector<2x128xf32>
    %20 = vector.extract_strided_slice %19 {offsets = [0, 0], sizes = [2, 32], strides = [1, 1]} : vector<2x128xf32> to vector<2x32xf32>
    %21 = arith.negf %20 : vector<2x32xf32>
    %22 = math.exp %21 : vector<2x32xf32>
    %cst_21 = arith.constant 1.000000e+00 : f32
    %23 = vector.broadcast %cst_21 : f32 to vector<2x32xf32>
    %24 = arith.addf %23, %22 : vector<2x32xf32>
    %25 = arith.divf %23, %24 : vector<2x32xf32>
    %26 = vector.extract_strided_slice %19 {offsets = [0, 32], sizes = [2, 32], strides = [1, 1]} : vector<2x128xf32> to vector<2x32xf32>
    %27 = arith.negf %26 : vector<2x32xf32>
    %28 = math.exp %27 : vector<2x32xf32>
    %cst_22 = arith.constant 1.000000e+00 : f32
    %29 = vector.broadcast %cst_22 : f32 to vector<2x32xf32>
    %30 = arith.addf %29, %28 : vector<2x32xf32>
    %31 = arith.divf %29, %30 : vector<2x32xf32>
    %32 = vector.extract_strided_slice %19 {offsets = [0, 64], sizes = [2, 32], strides = [1, 1]} : vector<2x128xf32> to vector<2x32xf32>
    %33 = math.tanh %32 : vector<2x32xf32>
    %34 = vector.extract_strided_slice %19 {offsets = [0, 96], sizes = [2, 32], strides = [1, 1]} : vector<2x128xf32> to vector<2x32xf32>
    %35 = arith.negf %34 : vector<2x32xf32>
    %36 = math.exp %35 : vector<2x32xf32>
    %cst_23 = arith.constant 1.000000e+00 : f32
    %37 = vector.broadcast %cst_23 : f32 to vector<2x32xf32>
    %38 = arith.addf %37, %36 : vector<2x32xf32>
    %39 = arith.divf %37, %38 : vector<2x32xf32>
    %40 = arith.mulf %31, %11 : vector<2x32xf32>
    %41 = arith.mulf %25, %33 : vector<2x32xf32>
    %42 = arith.addf %40, %41 : vector<2x32xf32>
    %43 = math.tanh %42 : vector<2x32xf32>
    %44 = arith.mulf %39, %43 : vector<2x32xf32>
    %cst_24 = arith.constant dense<0.000000e+00> : vector<2x12xf32>
    %45 = tpu.matmul %44, %5, %cst_24 {dimension_numbers = #tpu.dot_dimension_numbers<[1], [0], [0], [1], [0, 0, 1, 1], [], []>} : vector<2x32xf32>, vector<32x12xf32>, vector<2x12xf32> -> vector<2x12xf32>
    %46 = vector.broadcast %6 : vector<1x12xf32> to vector<2x12xf32>
    %47 = arith.addf %45, %46 : vector<2x12xf32>
    %48 = vector.extract_strided_slice %47 {offsets = [0, 0], sizes = [2, 4], strides = [1, 1]} : vector<2x12xf32> to vector<2x4xf32>
    %49 = math.exp %48 : vector<2x4xf32>
    %50 = vector.extract_strided_slice %47 {offsets = [0, 4], sizes = [2, 4], strides = [1, 1]} : vector<2x12xf32> to vector<2x4xf32>
    %51 = math.exp %50 : vector<2x4xf32>
    %52 = vector.extract_strided_slice %47 {offsets = [0, 8], sizes = [2, 4], strides = [1, 1]} : vector<2x12xf32> to vector<2x4xf32>
    %53 = math.exp %52 : vector<2x4xf32>
    %54 = arith.addf %12, %53 : vector<2x4xf32>
    %55 = vector.shape_cast %54 : vector<2x4xf32> to vector<2x4x1xf32>
    %56 = vector.broadcast %55 : vector<2x4x1xf32> to vector<2x4x12xf32>
    %57 = vector.broadcast %8 : vector<1x1x12xf32> to vector<2x4x12xf32>
    %58 = arith.subf %56, %57 : vector<2x4x12xf32>
    %59 = vector.shape_cast %49 : vector<2x4xf32> to vector<2x4x1xf32>
    %60 = vector.shape_cast %51 : vector<2x4xf32> to vector<2x4x1xf32>
    %cst_25 = arith.constant 0.000000e+00 : f32
    %61 = vector.broadcast %cst_25 : f32 to vector<2x4x1xf32>
    %62 = arith.subf %61, %60 : vector<2x4x1xf32>
    %63 = vector.broadcast %62 : vector<2x4x1xf32> to vector<2x4x12xf32>
    %64 = arith.mulf %63, %58 : vector<2x4x12xf32>
    %65 = arith.mulf %64, %58 : vector<2x4x12xf32>
    %66 = math.exp %65 : vector<2x4x12xf32>
    %67 = vector.broadcast %59 : vector<2x4x1xf32> to vector<2x4x12xf32>
    %68 = arith.mulf %67, %66 : vector<2x4x12xf32>
    %cst_26 = arith.constant dense<0.000000e+00> : vector<2x12xf32>
    %69 = vector.multi_reduction <add>, %68, %cst_26 [1] : vector<2x4x12xf32> to vector<2x12xf32>
    %70 = vector.shape_cast %69 : vector<2x12xf32> to vector<2x1x12xf32>
    "tpu.trace_start"() <{level = 10 : i32, message = "bqu,buc->bqc"}> : () -> ()
    %cst_27 = arith.constant dense<0.000000e+00> : vector<2x1x16xf32>
    %71 = tpu.matmul %70, %3, %cst_27 {dimension_numbers = #tpu.dot_dimension_numbers<[2], [1], [1], [2], [0, 0, 0, 1, 1, 2], [0], [0]>} : vector<2x1x12xf32>, vector<2x12x16xf32>, vector<2x1x16xf32> -> vector<2x1x16xf32>
    "tpu.trace_stop"() : () -> ()
    %72 = vector.shape_cast %71 : vector<2x1x16xf32> to vector<2x16xf32>
    %73 = tpu.concatenate %44, %72, %69, %9 in 1 : vector<2x32xf32>, vector<2x16xf32>, vector<2x12xf32>, vector<2x68xf32> -> vector<2x128xf32>
    %74 = arith.index_cast %c0_i32_17 : i32 to index
    %c0_28 = arith.constant 0 : index
    %c0_29 = arith.constant 0 : index
    %75 = vector.load %arg6[%74, %c0_28, %c0_29] : memref<4x2x128xf32, #tpu.memory_space<vmem>>, vector<1x2x128xf32>
    %76 = vector.shape_cast %75 : vector<1x2x128xf32> to vector<2x128xf32>
    %77 = vector.shape_cast %73 : vector<2x128xf32> to vector<1x2x128xf32>
    tpu.vector_store %arg6[%74, %c0_28, %c0_29], %77 {strides = array<i32>} : memref<4x2x128xf32, #tpu.memory_space<vmem>>, vector<1x2x128xf32>,
    %c1_i32 = arith.constant 1 : i32
    %78 = arith.index_cast %c1_i32 : i32 to index
    %c0_30 = arith.constant 0 : index
    %c0_31 = arith.constant 0 : index
    %79 = vector.load %arg1[%78, %c0_30, %c0_31] : memref<4x2x128xf32, #tpu.memory_space<vmem>>, vector<1x2x128xf32>
    %80 = vector.shape_cast %79 : vector<1x2x128xf32> to vector<2x128xf32>
    %81 = tpu.concatenate %72, %44 in 1 : vector<2x16xf32>, vector<2x32xf32> -> vector<2x48xf32>
    %cst_32 = arith.constant dense<0.000000e+00> : vector<2x128xf32>
    %82 = tpu.matmul %81, %4, %cst_32 {dimension_numbers = #tpu.dot_dimension_numbers<[1], [0], [0], [1], [0, 0, 1, 1], [], []>} : vector<2x48xf32>, vector<48x128xf32>, vector<2x128xf32> -> vector<2x128xf32>
    %83 = arith.addf %80, %82 : vector<2x128xf32>
    %84 = vector.extract_strided_slice %83 {offsets = [0, 0], sizes = [2, 32], strides = [1, 1]} : vector<2x128xf32> to vector<2x32xf32>
    %85 = arith.negf %84 : vector<2x32xf32>
    %86 = math.exp %85 : vector<2x32xf32>
    %cst_33 = arith.constant 1.000000e+00 : f32
    %87 = vector.broadcast %cst_33 : f32 to vector<2x32xf32>
    %88 = arith.addf %87, %86 : vector<2x32xf32>
    %89 = arith.divf %87, %88 : vector<2x32xf32>
    %90 = vector.extract_strided_slice %83 {offsets = [0, 32], sizes = [2, 32], strides = [1, 1]} : vector<2x128xf32> to vector<2x32xf32>
    %91 = arith.negf %90 : vector<2x32xf32>
    %92 = math.exp %91 : vector<2x32xf32>
    %cst_34 = arith.constant 1.000000e+00 : f32
    %93 = vector.broadcast %cst_34 : f32 to vector<2x32xf32>
    %94 = arith.addf %93, %92 : vector<2x32xf32>
    %95 = arith.divf %93, %94 : vector<2x32xf32>
    %96 = vector.extract_strided_slice %83 {offsets = [0, 64], sizes = [2, 32], strides = [1, 1]} : vector<2x128xf32> to vector<2x32xf32>
    %97 = math.tanh %96 : vector<2x32xf32>
    %98 = vector.extract_strided_slice %83 {offsets = [0, 96], sizes = [2, 32], strides = [1, 1]} : vector<2x128xf32> to vector<2x32xf32>
    %99 = arith.negf %98 : vector<2x32xf32>
    %100 = math.exp %99 : vector<2x32xf32>
    %cst_35 = arith.constant 1.000000e+00 : f32
    %101 = vector.broadcast %cst_35 : f32 to vector<2x32xf32>
    %102 = arith.addf %101, %100 : vector<2x32xf32>
    %103 = arith.divf %101, %102 : vector<2x32xf32>
    %104 = arith.mulf %95, %42 : vector<2x32xf32>
    %105 = arith.mulf %89, %97 : vector<2x32xf32>
    %106 = arith.addf %104, %105 : vector<2x32xf32>
    %107 = math.tanh %106 : vector<2x32xf32>
    %108 = arith.mulf %103, %107 : vector<2x32xf32>
    %cst_36 = arith.constant dense<0.000000e+00> : vector<2x12xf32>
    %109 = tpu.matmul %108, %5, %cst_36 {dimension_numbers = #tpu.dot_dimension_numbers<[1], [0], [0], [1], [0, 0, 1, 1], [], []>} : vector<2x32xf32>, vector<32x12xf32>, vector<2x12xf32> -> vector<2x12xf32>
    %110 = vector.broadcast %6 : vector<1x12xf32> to vector<2x12xf32>
    %111 = arith.addf %109, %110 : vector<2x12xf32>
    %112 = vector.extract_strided_slice %111 {offsets = [0, 0], sizes = [2, 4], strides = [1, 1]} : vector<2x12xf32> to vector<2x4xf32>
    %113 = math.exp %112 : vector<2x4xf32>
    %114 = vector.extract_strided_slice %111 {offsets = [0, 4], sizes = [2, 4], strides = [1, 1]} : vector<2x12xf32> to vector<2x4xf32>
    %115 = math.exp %114 : vector<2x4xf32>
    %116 = vector.extract_strided_slice %111 {offsets = [0, 8], sizes = [2, 4], strides = [1, 1]} : vector<2x12xf32> to vector<2x4xf32>
    %117 = math.exp %116 : vector<2x4xf32>
    %118 = arith.addf %54, %117 : vector<2x4xf32>
    %119 = vector.shape_cast %118 : vector<2x4xf32> to vector<2x4x1xf32>
    %120 = vector.broadcast %119 : vector<2x4x1xf32> to vector<2x4x12xf32>
    %121 = vector.broadcast %8 : vector<1x1x12xf32> to vector<2x4x12xf32>
    %122 = arith.subf %120, %121 : vector<2x4x12xf32>
    %123 = vector.shape_cast %113 : vector<2x4xf32> to vector<2x4x1xf32>
    %124 = vector.shape_cast %115 : vector<2x4xf32> to vector<2x4x1xf32>
    %cst_37 = arith.constant 0.000000e+00 : f32
    %125 = vector.broadcast %cst_37 : f32 to vector<2x4x1xf32>
    %126 = arith.subf %125, %124 : vector<2x4x1xf32>
    %127 = vector.broadcast %126 : vector<2x4x1xf32> to vector<2x4x12xf32>
    %128 = arith.mulf %127, %122 : vector<2x4x12xf32>
    %129 = arith.mulf %128, %122 : vector<2x4x12xf32>
    %130 = math.exp %129 : vector<2x4x12xf32>
    %131 = vector.broadcast %123 : vector<2x4x1xf32> to vector<2x4x12xf32>
    %132 = arith.mulf %131, %130 : vector<2x4x12xf32>
    %cst_38 = arith.constant dense<0.000000e+00> : vector<2x12xf32>
    %133 = vector.multi_reduction <add>, %132, %cst_38 [1] : vector<2x4x12xf32> to vector<2x12xf32>
    %134 = vector.shape_cast %133 : vector<2x12xf32> to vector<2x1x12xf32>
    "tpu.trace_start"() <{level = 10 : i32, message = "bqu,buc->bqc"}> : () -> ()
    %cst_39 = arith.constant dense<0.000000e+00> : vector<2x1x16xf32>
    %135 = tpu.matmul %134, %3, %cst_39 {dimension_numbers = #tpu.dot_dimension_numbers<[2], [1], [1], [2], [0, 0, 0, 1, 1, 2], [0], [0]>} : vector<2x1x12xf32>, vector<2x12x16xf32>, vector<2x1x16xf32> -> vector<2x1x16xf32>
    "tpu.trace_stop"() : () -> ()
    %136 = vector.shape_cast %135 : vector<2x1x16xf32> to vector<2x16xf32>
    %137 = tpu.concatenate %108, %136, %133, %9 in 1 : vector<2x32xf32>, vector<2x16xf32>, vector<2x12xf32>, vector<2x68xf32> -> vector<2x128xf32>
    %138 = arith.index_cast %c1_i32 : i32 to index
    %c0_40 = arith.constant 0 : index
    %c0_41 = arith.constant 0 : index
    %139 = vector.load %arg6[%138, %c0_40, %c0_41] : memref<4x2x128xf32, #tpu.memory_space<vmem>>, vector<1x2x128xf32>
    %140 = vector.shape_cast %139 : vector<1x2x128xf32> to vector<2x128xf32>
    %141 = vector.shape_cast %137 : vector<2x128xf32> to vector<1x2x128xf32>
    tpu.vector_store %arg6[%138, %c0_40, %c0_41], %141 {strides = array<i32>} : memref<4x2x128xf32, #tpu.memory_space<vmem>>, vector<1x2x128xf32>,
    %c2_i32 = arith.constant 2 : i32
    %142 = arith.index_cast %c2_i32 : i32 to index
    %c0_42 = arith.constant 0 : index
    %c0_43 = arith.constant 0 : index
    %143 = vector.load %arg1[%142, %c0_42, %c0_43] : memref<4x2x128xf32, #tpu.memory_space<vmem>>, vector<1x2x128xf32>
    %144 = vector.shape_cast %143 : vector<1x2x128xf32> to vector<2x128xf32>
    %145 = tpu.concatenate %136, %108 in 1 : vector<2x16xf32>, vector<2x32xf32> -> vector<2x48xf32>
    %cst_44 = arith.constant dense<0.000000e+00> : vector<2x128xf32>
    %146 = tpu.matmul %145, %4, %cst_44 {dimension_numbers = #tpu.dot_dimension_numbers<[1], [0], [0], [1], [0, 0, 1, 1], [], []>} : vector<2x48xf32>, vector<48x128xf32>, vector<2x128xf32> -> vector<2x128xf32>
    %147 = arith.addf %144, %146 : vector<2x128xf32>
    %148 = vector.extract_strided_slice %147 {offsets = [0, 0], sizes = [2, 32], strides = [1, 1]} : vector<2x128xf32> to vector<2x32xf32>
    %149 = arith.negf %148 : vector<2x32xf32>
    %150 = math.exp %149 : vector<2x32xf32>
    %cst_45 = arith.constant 1.000000e+00 : f32
    %151 = vector.broadcast %cst_45 : f32 to vector<2x32xf32>
    %152 = arith.addf %151, %150 : vector<2x32xf32>
    %153 = arith.divf %151, %152 : vector<2x32xf32>
    %154 = vector.extract_strided_slice %147 {offsets = [0, 32], sizes = [2, 32], strides = [1, 1]} : vector<2x128xf32> to vector<2x32xf32>
    %155 = arith.negf %154 : vector<2x32xf32>
    %156 = math.exp %155 : vector<2x32xf32>
    %cst_46 = arith.constant 1.000000e+00 : f32
    %157 = vector.broadcast %cst_46 : f32 to vector<2x32xf32>
    %158 = arith.addf %157, %156 : vector<2x32xf32>
    %159 = arith.divf %157, %158 : vector<2x32xf32>
    %160 = vector.extract_strided_slice %147 {offsets = [0, 64], sizes = [2, 32], strides = [1, 1]} : vector<2x128xf32> to vector<2x32xf32>
    %161 = math.tanh %160 : vector<2x32xf32>
    %162 = vector.extract_strided_slice %147 {offsets = [0, 96], sizes = [2, 32], strides = [1, 1]} : vector<2x128xf32> to vector<2x32xf32>
    %163 = arith.negf %162 : vector<2x32xf32>
    %164 = math.exp %163 : vector<2x32xf32>
    %cst_47 = arith.constant 1.000000e+00 : f32
    %165 = vector.broadcast %cst_47 : f32 to vector<2x32xf32>
    %166 = arith.addf %165, %164 : vector<2x32xf32>
    %167 = arith.divf %165, %166 : vector<2x32xf32>
    %168 = arith.mulf %159, %106 : vector<2x32xf32>
    %169 = arith.mulf %153, %161 : vector<2x32xf32>
    %170 = arith.addf %168, %169 : vector<2x32xf32>
    %171 = math.tanh %170 : vector<2x32xf32>
    %172 = arith.mulf %167, %171 : vector<2x32xf32>
    %cst_48 = arith.constant dense<0.000000e+00> : vector<2x12xf32>
    %173 = tpu.matmul %172, %5, %cst_48 {dimension_numbers = #tpu.dot_dimension_numbers<[1], [0], [0], [1], [0, 0, 1, 1], [], []>} : vector<2x32xf32>, vector<32x12xf32>, vector<2x12xf32> -> vector<2x12xf32>
    %174 = vector.broadcast %6 : vector<1x12xf32> to vector<2x12xf32>
    %175 = arith.addf %173, %174 : vector<2x12xf32>
    %176 = vector.extract_strided_slice %175 {offsets = [0, 0], sizes = [2, 4], strides = [1, 1]} : vector<2x12xf32> to vector<2x4xf32>
    %177 = math.exp %176 : vector<2x4xf32>
    %178 = vector.extract_strided_slice %175 {offsets = [0, 4], sizes = [2, 4], strides = [1, 1]} : vector<2x12xf32> to vector<2x4xf32>
    %179 = math.exp %178 : vector<2x4xf32>
    %180 = vector.extract_strided_slice %175 {offsets = [0, 8], sizes = [2, 4], strides = [1, 1]} : vector<2x12xf32> to vector<2x4xf32>
    %181 = math.exp %180 : vector<2x4xf32>
    %182 = arith.addf %118, %181 : vector<2x4xf32>
    %183 = vector.shape_cast %182 : vector<2x4xf32> to vector<2x4x1xf32>
    %184 = vector.broadcast %183 : vector<2x4x1xf32> to vector<2x4x12xf32>
    %185 = vector.broadcast %8 : vector<1x1x12xf32> to vector<2x4x12xf32>
    %186 = arith.subf %184, %185 : vector<2x4x12xf32>
    %187 = vector.shape_cast %177 : vector<2x4xf32> to vector<2x4x1xf32>
    %188 = vector.shape_cast %179 : vector<2x4xf32> to vector<2x4x1xf32>
    %cst_49 = arith.constant 0.000000e+00 : f32
    %189 = vector.broadcast %cst_49 : f32 to vector<2x4x1xf32>
    %190 = arith.subf %189, %188 : vector<2x4x1xf32>
    %191 = vector.broadcast %190 : vector<2x4x1xf32> to vector<2x4x12xf32>
    %192 = arith.mulf %191, %186 : vector<2x4x12xf32>
    %193 = arith.mulf %192, %186 : vector<2x4x12xf32>
    %194 = math.exp %193 : vector<2x4x12xf32>
    %195 = vector.broadcast %187 : vector<2x4x1xf32> to vector<2x4x12xf32>
    %196 = arith.mulf %195, %194 : vector<2x4x12xf32>
    %cst_50 = arith.constant dense<0.000000e+00> : vector<2x12xf32>
    %197 = vector.multi_reduction <add>, %196, %cst_50 [1] : vector<2x4x12xf32> to vector<2x12xf32>
    %198 = vector.shape_cast %197 : vector<2x12xf32> to vector<2x1x12xf32>
    "tpu.trace_start"() <{level = 10 : i32, message = "bqu,buc->bqc"}> : () -> ()
    %cst_51 = arith.constant dense<0.000000e+00> : vector<2x1x16xf32>
    %199 = tpu.matmul %198, %3, %cst_51 {dimension_numbers = #tpu.dot_dimension_numbers<[2], [1], [1], [2], [0, 0, 0, 1, 1, 2], [0], [0]>} : vector<2x1x12xf32>, vector<2x12x16xf32>, vector<2x1x16xf32> -> vector<2x1x16xf32>
    "tpu.trace_stop"() : () -> ()
    %200 = vector.shape_cast %199 : vector<2x1x16xf32> to vector<2x16xf32>
    %201 = tpu.concatenate %172, %200, %197, %9 in 1 : vector<2x32xf32>, vector<2x16xf32>, vector<2x12xf32>, vector<2x68xf32> -> vector<2x128xf32>
    %202 = arith.index_cast %c2_i32 : i32 to index
    %c0_52 = arith.constant 0 : index
    %c0_53 = arith.constant 0 : index
    %203 = vector.load %arg6[%202, %c0_52, %c0_53] : memref<4x2x128xf32, #tpu.memory_space<vmem>>, vector<1x2x128xf32>
    %204 = vector.shape_cast %203 : vector<1x2x128xf32> to vector<2x128xf32>
    %205 = vector.shape_cast %201 : vector<2x128xf32> to vector<1x2x128xf32>
    tpu.vector_store %arg6[%202, %c0_52, %c0_53], %205 {strides = array<i32>} : memref<4x2x128xf32, #tpu.memory_space<vmem>>, vector<1x2x128xf32>,
    %c3_i32 = arith.constant 3 : i32
    %206 = arith.index_cast %c3_i32 : i32 to index
    %c0_54 = arith.constant 0 : index
    %c0_55 = arith.constant 0 : index
    %207 = vector.load %arg1[%206, %c0_54, %c0_55] : memref<4x2x128xf32, #tpu.memory_space<vmem>>, vector<1x2x128xf32>
    %208 = vector.shape_cast %207 : vector<1x2x128xf32> to vector<2x128xf32>
    %209 = tpu.concatenate %200, %172 in 1 : vector<2x16xf32>, vector<2x32xf32> -> vector<2x48xf32>
    %cst_56 = arith.constant dense<0.000000e+00> : vector<2x128xf32>
    %210 = tpu.matmul %209, %4, %cst_56 {dimension_numbers = #tpu.dot_dimension_numbers<[1], [0], [0], [1], [0, 0, 1, 1], [], []>} : vector<2x48xf32>, vector<48x128xf32>, vector<2x128xf32> -> vector<2x128xf32>
    %211 = arith.addf %208, %210 : vector<2x128xf32>
    %212 = vector.extract_strided_slice %211 {offsets = [0, 0], sizes = [2, 32], strides = [1, 1]} : vector<2x128xf32> to vector<2x32xf32>
    %213 = arith.negf %212 : vector<2x32xf32>
    %214 = math.exp %213 : vector<2x32xf32>
    %cst_57 = arith.constant 1.000000e+00 : f32
    %215 = vector.broadcast %cst_57 : f32 to vector<2x32xf32>
    %216 = arith.addf %215, %214 : vector<2x32xf32>
    %217 = arith.divf %215, %216 : vector<2x32xf32>
    %218 = vector.extract_strided_slice %211 {offsets = [0, 32], sizes = [2, 32], strides = [1, 1]} : vector<2x128xf32> to vector<2x32xf32>
    %219 = arith.negf %218 : vector<2x32xf32>
    %220 = math.exp %219 : vector<2x32xf32>
    %cst_58 = arith.constant 1.000000e+00 : f32
    %221 = vector.broadcast %cst_58 : f32 to vector<2x32xf32>
    %222 = arith.addf %221, %220 : vector<2x32xf32>
    %223 = arith.divf %221, %222 : vector<2x32xf32>
    %224 = vector.extract_strided_slice %211 {offsets = [0, 64], sizes = [2, 32], strides = [1, 1]} : vector<2x128xf32> to vector<2x32xf32>
    %225 = math.tanh %224 : vector<2x32xf32>
    %226 = vector.extract_strided_slice %211 {offsets = [0, 96], sizes = [2, 32], strides = [1, 1]} : vector<2x128xf32> to vector<2x32xf32>
    %227 = arith.negf %226 : vector<2x32xf32>
    %228 = math.exp %227 : vector<2x32xf32>
    %cst_59 = arith.constant 1.000000e+00 : f32
    %229 = vector.broadcast %cst_59 : f32 to vector<2x32xf32>
    %230 = arith.addf %229, %228 : vector<2x32xf32>
    %231 = arith.divf %229, %230 : vector<2x32xf32>
    %232 = arith.mulf %223, %170 : vector<2x32xf32>
    %233 = arith.mulf %217, %225 : vector<2x32xf32>
    %234 = arith.addf %232, %233 : vector<2x32xf32>
    %235 = math.tanh %234 : vector<2x32xf32>
    %236 = arith.mulf %231, %235 : vector<2x32xf32>
    %cst_60 = arith.constant dense<0.000000e+00> : vector<2x12xf32>
    %237 = tpu.matmul %236, %5, %cst_60 {dimension_numbers = #tpu.dot_dimension_numbers<[1], [0], [0], [1], [0, 0, 1, 1], [], []>} : vector<2x32xf32>, vector<32x12xf32>, vector<2x12xf32> -> vector<2x12xf32>
    %238 = vector.broadcast %6 : vector<1x12xf32> to vector<2x12xf32>
    %239 = arith.addf %237, %238 : vector<2x12xf32>
    %240 = vector.extract_strided_slice %239 {offsets = [0, 0], sizes = [2, 4], strides = [1, 1]} : vector<2x12xf32> to vector<2x4xf32>
    %241 = math.exp %240 : vector<2x4xf32>
    %242 = vector.extract_strided_slice %239 {offsets = [0, 4], sizes = [2, 4], strides = [1, 1]} : vector<2x12xf32> to vector<2x4xf32>
    %243 = math.exp %242 : vector<2x4xf32>
    %244 = vector.extract_strided_slice %239 {offsets = [0, 8], sizes = [2, 4], strides = [1, 1]} : vector<2x12xf32> to vector<2x4xf32>
    %245 = math.exp %244 : vector<2x4xf32>
    %246 = arith.addf %182, %245 : vector<2x4xf32>
    %247 = vector.shape_cast %246 : vector<2x4xf32> to vector<2x4x1xf32>
    %248 = vector.broadcast %247 : vector<2x4x1xf32> to vector<2x4x12xf32>
    %249 = vector.broadcast %8 : vector<1x1x12xf32> to vector<2x4x12xf32>
    %250 = arith.subf %248, %249 : vector<2x4x12xf32>
    %251 = vector.shape_cast %241 : vector<2x4xf32> to vector<2x4x1xf32>
    %252 = vector.shape_cast %243 : vector<2x4xf32> to vector<2x4x1xf32>
    %cst_61 = arith.constant 0.000000e+00 : f32
    %253 = vector.broadcast %cst_61 : f32 to vector<2x4x1xf32>
    %254 = arith.subf %253, %252 : vector<2x4x1xf32>
    %255 = vector.broadcast %254 : vector<2x4x1xf32> to vector<2x4x12xf32>
    %256 = arith.mulf %255, %250 : vector<2x4x12xf32>
    %257 = arith.mulf %256, %250 : vector<2x4x12xf32>
    %258 = math.exp %257 : vector<2x4x12xf32>
    %259 = vector.broadcast %251 : vector<2x4x1xf32> to vector<2x4x12xf32>
    %260 = arith.mulf %259, %258 : vector<2x4x12xf32>
    %cst_62 = arith.constant dense<0.000000e+00> : vector<2x12xf32>
    %261 = vector.multi_reduction <add>, %260, %cst_62 [1] : vector<2x4x12xf32> to vector<2x12xf32>
    %262 = vector.shape_cast %261 : vector<2x12xf32> to vector<2x1x12xf32>
    "tpu.trace_start"() <{level = 10 : i32, message = "bqu,buc->bqc"}> : () -> ()
    %cst_63 = arith.constant dense<0.000000e+00> : vector<2x1x16xf32>
    %263 = tpu.matmul %262, %3, %cst_63 {dimension_numbers = #tpu.dot_dimension_numbers<[2], [1], [1], [2], [0, 0, 0, 1, 1, 2], [0], [0]>} : vector<2x1x12xf32>, vector<2x12x16xf32>, vector<2x1x16xf32> -> vector<2x1x16xf32>
    "tpu.trace_stop"() : () -> ()
    %264 = vector.shape_cast %263 : vector<2x1x16xf32> to vector<2x16xf32>
    %265 = tpu.concatenate %236, %264, %261, %9 in 1 : vector<2x32xf32>, vector<2x16xf32>, vector<2x12xf32>, vector<2x68xf32> -> vector<2x128xf32>
    %266 = arith.index_cast %c3_i32 : i32 to index
    %c0_64 = arith.constant 0 : index
    %c0_65 = arith.constant 0 : index
    %267 = vector.load %arg6[%266, %c0_64, %c0_65] : memref<4x2x128xf32, #tpu.memory_space<vmem>>, vector<1x2x128xf32>
    %268 = vector.shape_cast %267 : vector<1x2x128xf32> to vector<2x128xf32>
    %269 = vector.shape_cast %265 : vector<2x128xf32> to vector<1x2x128xf32>
    tpu.vector_store %arg6[%266, %c0_64, %c0_65], %269 {strides = array<i32>} : memref<4x2x128xf32, #tpu.memory_space<vmem>>, vector<1x2x128xf32>,
    %c4_i32 = arith.constant 4 : i32
    %c0_66 = arith.constant 0 : index
    %c0_67 = arith.constant 0 : index
    %270 = vector.load %arg7[%c0_66, %c0_67] : memref<2x32xf32, #tpu.memory_space<vmem>>, vector<2x32xf32>
    tpu.vector_store %arg7[%c0_66, %c0_67], %236 {strides = array<i32>} : memref<2x32xf32, #tpu.memory_space<vmem>>, vector<2x32xf32>,
    %c0_68 = arith.constant 0 : index
    %c0_69 = arith.constant 0 : index
    %271 = vector.load %arg8[%c0_68, %c0_69] : memref<2x32xf32, #tpu.memory_space<vmem>>, vector<2x32xf32>
    tpu.vector_store %arg8[%c0_68, %c0_69], %234 {strides = array<i32>} : memref<2x32xf32, #tpu.memory_space<vmem>>, vector<2x32xf32>,
    %c0_70 = arith.constant 0 : index
    %c0_71 = arith.constant 0 : index
    %272 = vector.load %arg9[%c0_70, %c0_71] : memref<2x4xf32, #tpu.memory_space<vmem>>, vector<2x4xf32>
    tpu.vector_store %arg9[%c0_70, %c0_71], %246 {strides = array<i32>} : memref<2x4xf32, #tpu.memory_space<vmem>>, vector<2x4xf32>,
    %c0_72 = arith.constant 0 : index
    %c0_73 = arith.constant 0 : index
    %273 = vector.load %arg10[%c0_72, %c0_73] : memref<2x16xf32, #tpu.memory_space<vmem>>, vector<2x16xf32>
    tpu.vector_store %arg10[%c0_72, %c0_73], %264 {strides = array<i32>} : memref<2x16xf32, #tpu.memory_space<vmem>>, vector<2x16xf32>,
    return
  }
  func.func @transform_0(%arg0: i32) -> (i32, i32, i32) {
    %c0_i32 = arith.constant 0 : i32
    %c0_i32_0 = arith.constant 0 : i32
    %c0_i32_1 = arith.constant 0 : i32
    return %arg0, %c0_i32, %c0_i32_0 : i32, i32, i32
  }
  func.func @transform_1(%arg0: i32) -> (i32, i32, i32) {
    %c0_i32 = arith.constant 0 : i32
    %c0_i32_0 = arith.constant 0 : i32
    %c0_i32_1 = arith.constant 0 : i32
    %c0_i32_2 = arith.constant 0 : i32
    return %c0_i32, %c0_i32_0, %c0_i32_1 : i32, i32, i32
  }
  func.func @transform_2(%arg0: i32) -> (i32, i32) {
    %c0_i32 = arith.constant 0 : i32
    %c0_i32_0 = arith.constant 0 : i32
    %c0_i32_1 = arith.constant 0 : i32
    return %c0_i32, %c0_i32_0 : i32, i32
  }
  func.func @transform_3(%arg0: i32) -> (i32, i32) {
    %c0_i32 = arith.constant 0 : i32
    %c0_i32_0 = arith.constant 0 : i32
    %c0_i32_1 = arith.constant 0 : i32
    return %c0_i32, %c0_i32_0 : i32, i32
  }
  func.func @transform_4(%arg0: i32) -> (i32, i32) {
    %c0_i32 = arith.constant 0 : i32
    %c0_i32_0 = arith.constant 0 : i32
    %c0_i32_1 = arith.constant 0 : i32
    return %c0_i32, %c0_i32_0 : i32, i32
  }
  func.func @transform_5(%arg0: i32) -> (i32, i32, i32) {
    %c0_i32 = arith.constant 0 : i32
    %c0_i32_0 = arith.constant 0 : i32
    %c0_i32_1 = arith.constant 0 : i32
    return %arg0, %c0_i32, %c0_i32_0 : i32, i32, i32
  }
}

</mosaic_0001>

<bundles_post_ra>
// kernel: _lambda_.1
= control target key start
LH: loop header
LB: loop body
LE: loop exit
PB: predicated region body
PF: predicated region fallthrough
CT: control target
= control target key end

     0   :  { %s2502_s18 = smov 0   ;;  %s2881_s0 = inlined_call_operand.vmem [shape: f32[12,2,128], index: 0, kind: input, shape index: {}]   ;;  %s2882_s1 = inlined_call_operand.vmem [shape: f32[2,12,16], index: 1, kind: input, shape index: {}]   ;;  %s2883_s2 = inlined_call_operand.vmem [shape: f32[48,128], index: 2, kind: input, shape index: {}]   ;;  %s2884_s3 = inlined_call_operand.vmem [shape: f32[32,12], index: 3, kind: input, shape index: {}]   ;;  %s2885_s4 = inlined_call_operand.vmem [shape: f32[1,12], index: 4, kind: input, shape index: {}]   ;;  %s2886_s5 = inlined_call_operand.vmem [shape: f32[12,2,128], index: 5, kind: output, shape index: {}]  }
   0x1 LB: > { %s2007_s19 = sadd.s32 4294967295, %s2459_s18   ;;  %p2011_p0 = scmp.ge.s32.totalorder %s2459_s18, 1  ;;  %s2459_s18 = sphi %s2502_s18, %s15_s18  }
   0x2   : > { %p188_p1 = scmp.lt.s32.totalorder %s2459_s18, 4 }
   0x4   : > { %p189_p2 = pnand %p2011_p0, %p188_p1 }
   0x5   : > { %s2012_s20 = sshll.u32 (!%p189_p2), %s2007_s19, 2  ;;  %p2016_p4 = scmp.ne.s32.totalorder (!%p189_p2), %s2007_s19, 0 }
   0x6   : > { %192 = sbr.rel (%p189_p2) target bundleno = 5920 (0x1720), region = 40  ;;  %p217_p3 = scmp.lt.s32.totalorder (!%p189_p2), %s2012_s20, 11 }
   0xd   : > { %s2890_s20 = smov (!%p217_p3, %s2012_s20), 11  ;;  %231 = sbr.rel (%p2016_p4) target bundleno = 20 (0x14), region = 44 }
   0xe   : > { %s2013_s21 = sshll.u32 %s2890_s20, 1  ;;  %vm232_vm0 = vcmask (!%p2016_p4), 254976   ;;  %vm235_vm1 = vcmask (!%p2016_p4), 25600   ;;  %vm237_vm2 = vcmask (!%p2016_p4), 123904   ;;  %v2461_v0 = vmov (!%p2016_p4), 0.0  }
   0xf   : > { %s2513_s24 = scalar_lea.vmem %s2881_s0, %s2013_s21  ;;  %s2518_s27 = scalar_lea.vmem %s2886_s5, %s2013_s21  ;;  %233 = vst.msk [vmem:[#allocation2] sm:$0x3] (!%p2016_p4), %vm232_vm0, %v2461_v0  ;;  %234 = vst.msk [vmem:[#allocation3] sm:$0x3] (!%p2016_p4), %vm232_vm0, %v2461_v0 }
  0x10   : > { %236 = vst.msk [vmem:[#allocation4] sm:$0x3] (!%p2016_p4), %vm235_vm1, %v2461_v0 }
  0x11   : > { %238 = vst.msk [vmem:[#allocation5] sm:$0x3] (!%p2016_p4), %vm237_vm2, %v2461_v0 }
  0x14 PF: > { %v243_v2 = vld [vmem:[%s2883_s2] sm:$0xff]  ;;  %v244_v3 = vld [vmem:[%s2883_s2 + $0x8] sm:$0xff]  ;;  %s2462_s7 = smov 16   ;;  %v2463_v4 = vmov 0.0|0.0   ;;  %v245_v6 = vld [vmem:[%s2883_s2 + $0x10] sm:$0xff]  ;;  %vm2464_vm3 = vmmov 0   ;;  %v254_v47 = vlaneseq }
  0x15   : > { %2286 = vmatprep.subr.bf16.mxu0 %v2463_v4  ;;  %v2527_v5 = vpack.c.bf16 %v244_v3, %v243_v2  ;;  %v246_v7 = vld [vmem:[%s2883_s2 + $0x18] sm:$0xff]  ;;  %v2465_v8 = vmov 0.0   ;;  %2295 = vmatprep.subr.bf16.mxu1 %v2463_v4  ;;  %v247_v11 = vld [vmem:[%s2883_s2 + $0x20] sm:$0xff]  ;;  %v248_v12 = vld [vmem:[%s2883_s2 + $0x28] sm:$0xff]  ;;  %s2466_s16 = smov 32   ;;  %vm266_vm4 = vcmask 130048  }
  0x16   : > { %v257_v1 = vld [vmem:[#allocation2] sm:$0x3]  ;;  %2138 = vmatprep.mubr.msk.f32.mxu0 %vm2464_vm3, %v2465_v8  ;;  %v258_v9 = vld [vmem:[#allocation3] sm:$0x3]  ;;  %v2539_v10 = vpack.c.bf16 %v246_v7, %v245_v6  ;;  %2149 = vmatprep.mubr.msk.f32.mxu1 %vm2464_vm3, %v2465_v8  ;;  %v2552_v13 = vpack.c.bf16 %v248_v12, %v247_v11  ;;  %vm268_vm5 = vcmask 392192   ;;  %s2467_s17 = smov 64  }
  0x17   : > { %263 = vrot.lane.b32.xlu0 %v257_v1, %s2462_s7  ;;  %2288 = vmatpush3.bf16.msra.mxu0 %v2527_v5  ;;  %v261_v17 = vld [vmem:[%s2513_s24] sm:$0x3]  ;;  %v250_v33 = vld [vmem:[%s2884_s3 + $0x8] sm:$0xff]  ;;  %v251_v34 = vld [vmem:[%s2884_s3 + $0x10] sm:$0xff]  ;;  %vm380_vm6 = vcmask 261120   ;;  %v461_v48 = vshrl.u32 %v254_v47, 7 }
  0x18   : > { %2289 = vmatprep.subr.bf16.mxu0 %v2463_v4  ;;  %351 = vrot.lane.b32.xlu1 %v258_v9, %s2466_s16  ;;  %v260_v14 = vld [vmem:[#allocation5] sm:$0x3]  ;;  %v252_v36 = vld [vmem:[%s2884_s3 + $0x18] sm:$0xff]  ;;  %v2598_v42 = vld [vmem:[%s2885_s4] ss:$0 sm:$0xff]  ;;  %s2468_s6 = smov 120  }
  0x19   : > { %v249_v32 = vld [vmem:[%s2884_s3] sm:$0xff]  ;;  %v2582_v37 = vpack.c.bf16 %v252_v36, %v251_v34  ;;  %v2601_v49 = vsub.s32 1, %v461_v48  ;;  %v2605_v52 = vsub.s32 0, %v461_v48  ;;  %s2469_s7 = smov 48   ;;  %v241_v59 = vld [vmem:[%s2882_s1 + $0x10] sm:$0xff]  ;;  %vm529_vm7 = vcmask 1043456  }
  0x1a   : > { %v2576_v35 = vpack.c.bf16 %v250_v33, %v249_v32  ;;  %v259_v54 = vld [vmem:[#allocation4] sm:$0x3]  ;;  %v242_v60 = vld [vmem:[%s2882_s1 + $0x18] sm:$0xf]  ;;  %vm2470_vm8 = vmmov 1   ;;  %v255_v2 = vand.u32 127, %v254_v47 }
  0x1b   : > { %2291 = vmatpush3.bf16.msra.mxu0 %v2539_v10  ;;  %v2621_v61 = vpack.c.bf16 %v242_v60, %v241_v59  ;;  %vm2623_vm9 = vmpackc.low %vm529_vm7, %vm2470_vm8  ;;  %v239_v63 = vld [vmem:[%s2882_s1] sm:$0xff]  ;;  %v240_v0 = vld [vmem:[%s2882_s1 + $0x8] sm:$0xf]  ;;  %vm510_vm10 = vcmask 93184   ;;  %vm525_vm11 = vcmask 97280   ;;  %vm683_vm12 = vcmask 1041409  }
  0x1c   : > { %2292 = vmatprep.subr.bf16.mxu0 %v2463_v4  ;;  %2297 = vmatpush3.bf16.msra.mxu1 %v2576_v35  ;;  %v2637_v1 = vpack.c.bf16 %v240_v0, %v239_v63  ;;  %v2643_v6 = vcvt.s32.f32 %v255_v2  ;;  %v2025_v60 = vld [vmem:[%s2513_s24 + $0x2] sm:$0x3]  ;;  %vm1939_vm13 = vcmask 254976   ;;  %vm1946_vm14 = vcmask 25600  }
  0x1d   : > { %2298 = vmatprep.subr.bf16.mxu1 %v2463_v4  ;;  %vm694_vm15 = vcmask 490496   ;;  %vm1949_vm0 = vcmask 123904  }
  0x1f   : > { %2294 = vmatpush3.bf16.msra.mxu0 %v2552_v13 }
  0x20   : > { %2305 = vmatprep.subr.bf16.mxu0 %v2463_v4  ;;  %2300 = vmatpush3.bf16.msra.mxu1 %v2582_v37 }
  0x21   : > { %2301 = vmatprep.subr.bf16.mxu1 %v2463_v4 }
  0x89   : > { %v264_v15 = vpop.permute.xlu0 %263 }
  0x8a   : > { %v267_v16 = vsel %vm266_vm4, %v260_v14, %v264_v15  ;;  %v352_v28 = vpop.permute.xlu1 %351 }
  0x8b   : > { %2139 = vmatmul.mubr.msk.f32.vlgmr.msra.gmra.mrb[0].mxu0 %vm268_vm5, %v267_v16 }
  0x8c   : > { %2163 = vmatprep.mubr.msk.f32.mxu0 %vm2464_vm3, %v2465_v8  ;;  %2308 = vmatpush3.bf16.msk.msra.mxu0 %vm2623_vm9, %v2621_v61 }
  0x8d   : > { %2318 = vmatprep.subr.bf16.mxu0 %v2463_v4 }
 0x15e   : > { %v338_v18 = vpop.f32.mrb[0].mxu0 }
 0x15f   : > { %v342_v19 = vadd.f32 %v338_v18, %v261_v17  ;;  %v2140_v20 = vpop.f32.mrb[1].mxu0 }
 0x161   : > { %2397 = vtanh.f32 %v342_v19  ;;  %v2018_v22 = vmul.f32 -1.442695, %v342_v19 }
 0x163   : > { %2399 = vpow2.f32 %v2018_v22 }
 0x16b   : > { %v2398_v21 = vpop.eup %2397 }
 0x16c   : > { %356 = vrot.lane.b32.xlu0 %v2398_v21, %s2467_s17 }
 0x16d   : > { %v2400_v23 = vpop.eup %2399 }
 0x16e   : > { %v346_v24 = vadd.f32 1.0, %v2400_v23 }
 0x170   : > { %2401 = vrcp.f32 %v346_v24 }
 0x17a   : > { %v2402_v25 = vpop.eup %2401 }
 0x17b   : > { %v354_v29 = vmul.f32 %v2402_v25, %v352_v28 }
 0x1de   : > { %v357_v26 = vpop.permute.xlu0 %356 }
 0x1df   : > { %v359_v27 = vmul.f32 %v2402_v25, %v357_v26 }
 0x1e1   : > { %361 = vrot.lane.b32.xlu1 %v359_v27, %s2466_s16 }
 0x253   : > { %v362_v30 = vpop.permute.xlu1 %361 }
 0x254   : > { %v2564_v31 = vadd.f32 %v362_v30, %v354_v29 }
 0x256   : > { %2403 = vtanh.f32 %v2564_v31 }
 0x260   : > { %v2404_v38 = vpop.eup %2403 }
 0x261   : > { %367 = vrot.lane.b32.xlu0 %v2404_v38, %s2467_s17 }
 0x2d3   : > { %v368_v39 = vpop.permute.xlu0 %367 }
 0x2d4   : > { %v370_v40 = vmul.f32 %v2402_v25, %v368_v39 }
 0x2d6   : > { %378 = vrot.lane.b32.xlu1 %v370_v40, %s2466_s16 }
 0x348   : > { %v2589_v41 = vpop.permute.xlu1 %378 }
 0x349   : > { %2150 = vmatmul.mubr.msk.f32.vlgmr.msra.gmra.mrb[0].mxu1 %vm380_vm6, %v2589_v41 }
 0x34a   : > { %2156 = vmatprep.mubr.msk.f32.mxu1 %vm2464_vm3, %v2465_v8  ;;  %2304 = vmatpush3.bf16.msk.msra.mxu1 %vm2623_vm9, %v2637_v1 }
 0x34b   : > { %2309 = vmatprep.subr.bf16.mxu1 %v2463_v4 }
 0x41c   : > { %v449_v43 = vpop.f32.mrb[0].mxu1 }
 0x41d   : > { %v450_v44 = vadd.f32 %v2598_v42, %v449_v43  ;;  %v2151_v45 = vpop.f32.mrb[1].mxu1 }
 0x41f   : > { %v453_v46 = vmul.f32 1.442695, %v450_v44 }
 0x421   : > { %2405 = vpow2.f32 %v453_v46 }
 0x42b   : > { %v2406_v50 = vpop.eup %2405 }
 0x42c   : > { %456 = vrot.lane.b32.xlu0 %v2406_v50, %s2468_s6  ;;  %v486_v51 = vrot.slane %v2406_v50, %v2601_v49  ;;  %v479_v53 = vrot.slane %v2406_v50, %v2605_v52 }
 0x430   : > { %496 = vbcast.lane.b32.xlu0 %v486_v51, 260 }
 0x434   : > { %492 = vbcast.lane.b32.xlu0 %v479_v53, 260 }
 0x438   : > { %481 = vbcast.lane.b32.xlu0 %v479_v53, 256 }
 0x49e   : > { %v457_v55 = vpop.permute.xlu0 %456 }
 0x49f   : > { %v2608_v56 = vadd.f32 %v457_v55, %v259_v54 }
 0x4a1   : > { %v470_v57 = vrot.slane %v2608_v56, %v2601_v49  ;;  %v463_v58 = vrot.slane %v2608_v56, %v2605_v52 }
 0x4a2   : > { %v497_v3 = vpop.permute.xlu0 %496 }
 0x4a3   : > { %472 = vbcast.lane.b32.xlu1 %v470_v57, 256  ;;  %v499_v9 = vsub.f32 0.0, %v497_v3 }
 0x4a6   : > { %v493_v12 = vpop.permute.xlu0 %492 }
 0x4a7   : > { %465 = vbcast.lane.b32.xlu1 %v463_v58, 256  ;;  %v498_v16 = vsub.f32 0.0, %v493_v12 }
 0x4aa   : > { %v482_v28 = vpop.permute.xlu0 %481 }
 0x4ab   : > { %488 = vbcast.lane.b32.xlu1 %v486_v51, 256 }
 0x4af   : > { %700 = vrot.lane.b32.xlu1 %v370_v40, %s2469_s7 }
 0x515   : > { %v473_v7 = vpop.permute.xlu1 %472 }
 0x516   : > { %v475_v11 = vsub.f32 %v473_v7, %v2643_v6 }
 0x518   : > { %v501_v14 = vmul.f32 %v499_v9, %v475_v11 }
 0x519   : > { %v466_v15 = vpop.permute.xlu1 %465 }
 0x51a   : > { %v503_v17 = vmul.f32 %v501_v14, %v475_v11  ;;  %v474_v18 = vsub.f32 %v466_v15, %v2643_v6 }
 0x51c   : > { %v506_v19 = vmul.f32 1.442695, %v503_v17  ;;  %v500_v20 = vmul.f32 %v498_v16, %v474_v18 }
 0x51d   : > { %v489_v24 = vpop.permute.xlu1 %488 }
 0x51e   : > { %2407 = vpow2.f32 %v506_v19  ;;  %v502_v21 = vmul.f32 %v500_v20, %v474_v18 }
 0x520   : > { %v504_v22 = vmul.f32 1.442695, %v502_v21 }
 0x521   : > { %v701_v55 = vpop.permute.xlu1 %700 }
 0x522   : > { %2409 = vpow2.f32 %v504_v22 }
 0x528   : > { %v2408_v23 = vpop.eup %2407 }
 0x529   : > { %v509_v25 = vmul.f32 %v2408_v23, %v489_v24 }
 0x52b   : > { %v518_v26 = vsel %vm510_vm10, %v509_v25, 0.0 }
 0x52c   : > { %v2410_v27 = vpop.eup %2409  ;;  %v519_v29 = vrot.slane %v518_v26, 4 }
 0x52d   : > { %v508_v30 = vmul.f32 %v2410_v27, %v482_v28 }
 0x52e   : > { %v520_v32 = vadd.f32 %v519_v29, %v518_v26 }
 0x52f   : > { %v511_v33 = vsel %vm510_vm10, %v508_v30, 0.0 }
 0x530   : > { %v512_v34 = vrot.slane %v511_v33, 4  ;;  %v521_v36 = vrot.slane %v520_v32, 2 }
 0x532   : > { %v522_v38 = vadd.f32 %v521_v36, %v520_v32  ;;  %v513_v39 = vadd.f32 %v512_v34, %v511_v33 }
 0x534   : > { %v523_v40 = vrot.slane %v522_v38, 1  ;;  %v514_v43 = vrot.slane %v513_v39, 2 }
 0x536   : > { %v524_v44 = vadd.f32 %v523_v40, %v522_v38  ;;  %v515_v45 = vadd.f32 %v514_v43, %v513_v39 }
 0x538   : > { %2164 = vmatmul.mubr.msk.f32.vlgmr.msra.gmra.mrb[2].mxu0 %vm525_vm11, %v524_v44  ;;  %v516_v46 = vrot.slane %v515_v45, 1 }
 0x539   : > { %2320 = vmatpush3.bf16.msra.mxu0 %v2576_v35  ;;  %2189 = vmatprep.mubr.msk.f32.mxu0 %vm2464_vm3, %v2465_v8 }
 0x53a   : > { %v517_v47 = vadd.f32 %v516_v46, %v515_v45  ;;  %2321 = vmatprep.subr.bf16.mxu0 %v2463_v4 }
 0x53c   : > { %2157 = vmatmul.mubr.msk.f32.vlgmr.msra.gmra.mrb[2].mxu1 %vm525_vm11, %v517_v47  ;;  %v2656_v48 = vsel %vm683_vm12, %v524_v44, %v517_v47 }
 0x53d   : > { %2311 = vmatpush3.bf16.msra.mxu1 %v2527_v5  ;;  %2178 = vmatprep.mubr.msk.f32.mxu1 %vm2464_vm3, %v2465_v8 }
 0x53e   : > { %2312 = vmatprep.subr.bf16.mxu1 %v2463_v4  ;;  %2323 = vmatpush3.bf16.msra.mxu0 %v2582_v37 }
 0x53f   : > { %2324 = vmatprep.subr.bf16.mxu0 %v2463_v4 }
 0x541   : > { %2314 = vmatpush3.bf16.msra.mxu1 %v2539_v10 }
 0x542   : > { %2315 = vmatprep.subr.bf16.mxu1 %v2463_v4 }
 0x545   : > { %2317 = vmatpush3.bf16.msra.mxu1 %v2552_v13 }
 0x546   : > { %2328 = vmatprep.subr.bf16.mxu1 %v2463_v4 }
 0x60b   : > { %v675_v50 = vpop.f32.mrb[2].mxu0 }
 0x60c   : > { %v2165_v51 = vpop.f32.mrb[3].mxu0  ;;  %v682_v53 = vrot.slane %v675_v50, 7 }
 0x60f   : > { %v599_v54 = vpop.f32.mrb[2].mxu1 }
 0x610   : > { %v2669_v57 = vsel %vm683_vm12, %v682_v53, %v599_v54  ;;  %v2158_v58 = vpop.f32.mrb[3].mxu1 }
 0x611   : > { %v703_v59 = vsel %vm266_vm4, %v2669_v57, %v701_v55 }
 0x612   : > { %2179 = vmatmul.mubr.msk.f32.vlgmr.msra.gmra.mrb[4].mxu1 %vm268_vm5, %v703_v59 }
 0x613   : > { %2331 = vmatpush3.bf16.msk.msra.mxu1 %vm2623_vm9, %v2621_v61  ;;  %2203 = vmatprep.mubr.msk.f32.mxu1 %vm2464_vm3, %v2465_v8 }
 0x614   : > { %2341 = vmatprep.subr.bf16.mxu1 %v2463_v4 }
 0x6e5   : > { %v773_v63 = vpop.f32.mrb[4].mxu1 }
 0x6e6   : > { %v777_v0 = vadd.f32 %v2025_v60, %v773_v63  ;;  %v2180_v2 = vpop.f32.mrb[5].mxu1 }
 0x6e8   : > { %2411 = vtanh.f32 %v777_v0  ;;  %v2027_v7 = vmul.f32 -1.442695, %v777_v0 }
 0x6ea   : > { %2413 = vpow2.f32 %v2027_v7 }
 0x6f2   : > { %v2412_v3 = vpop.eup %2411 }
 0x6f3   : > { %787 = vrot.lane.b32.xlu0 %v2412_v3, %s2467_s17 }
 0x6f4   : > { %v2414_v9 = vpop.eup %2413 }
 0x6f5   : > { %v781_v11 = vadd.f32 1.0, %v2414_v9 }
 0x6f7   : > { %2415 = vrcp.f32 %v781_v11 }
 0x701   : > { %v2416_v12 = vpop.eup %2415 }
 0x702   : > { %v785_v16 = vmul.f32 %v2416_v12, %v2564_v31 }
 0x765   : > { %v788_v14 = vpop.permute.xlu0 %787 }
 0x766   : > { %v790_v15 = vmul.f32 %v2416_v12, %v788_v14 }
 0x768   : > { %792 = vrot.lane.b32.xlu1 %v790_v15, %s2466_s16 }
 0x7da   : > { %v793_v17 = vpop.permute.xlu1 %792 }
 0x7db   : > { %v2684_v18 = vadd.f32 %v793_v17, %v785_v16 }
 0x7dd   : > { %2417 = vtanh.f32 %v2684_v18 }
 0x7e7   : > { %v2418_v19 = vpop.eup %2417 }
 0x7e8   : > { %798 = vrot.lane.b32.xlu0 %v2418_v19, %s2467_s17 }
 0x85a   : > { %v799_v20 = vpop.permute.xlu0 %798 }
 0x85b   : > { %v801_v21 = vmul.f32 %v2416_v12, %v799_v20 }
 0x85d   : > { %803 = vrot.lane.b32.xlu1 %v801_v21, %s2466_s16 }
 0x8cf   : > { %v2689_v22 = vpop.permute.xlu1 %803 }
 0x8d0   : > { %2190 = vmatmul.mubr.msk.f32.vlgmr.msra.gmra.mrb[4].mxu0 %vm380_vm6, %v2689_v22 }
 0x8d1   : > { %2327 = vmatpush3.bf16.msk.msra.mxu0 %vm2623_vm9, %v2637_v1  ;;  %2196 = vmatprep.mubr.msk.f32.mxu0 %vm2464_vm3, %v2465_v8 }
 0x8d2   : > { %2332 = vmatprep.subr.bf16.mxu0 %v2463_v4 }
 0x9a3   : > { %v873_v31 = vpop.f32.mrb[4].mxu0 }
 0x9a4   : > { %v874_v23 = vadd.f32 %v2598_v42, %v873_v31  ;;  %v2191_v24 = vpop.f32.mrb[5].mxu0 }
 0x9a6   : > { %v877_v25 = vmul.f32 1.442695, %v874_v23 }
 0x9a8   : > { %2419 = vpow2.f32 %v877_v25 }
 0x9b2   : > { %v2420_v26 = vpop.eup %2419 }
 0x9b3   : > { %880 = vrot.lane.b32.xlu0 %v2420_v26, %s2468_s6  ;;  %v910_v27 = vrot.slane %v2420_v26, %v2601_v49  ;;  %v903_v28 = vrot.slane %v2420_v26, %v2605_v52 }
 0x9b7   : > { %920 = vbcast.lane.b32.xlu0 %v910_v27, 260 }
 0x9bb   : > { %916 = vbcast.lane.b32.xlu0 %v903_v28, 260 }
 0x9bf   : > { %905 = vbcast.lane.b32.xlu0 %v903_v28, 256 }
 0xa25   : > { %v881_v29 = vpop.permute.xlu0 %880 }
 0xa26   : > { %v2704_v30 = vadd.f32 %v881_v29, %v2608_v56 }
 0xa28   : > { %v894_v32 = vrot.slane %v2704_v30, %v2601_v49  ;;  %v887_v33 = vrot.slane %v2704_v30, %v2605_v52 }
 0xa29   : > { %v921_v34 = vpop.permute.xlu0 %920 }
 0xa2a   : > { %896 = vbcast.lane.b32.xlu1 %v894_v32, 256  ;;  %v923_v38 = vsub.f32 0.0, %v921_v34 }
 0xa2d   : > { %v917_v40 = vpop.permute.xlu0 %916 }
 0xa2e   : > { %889 = vbcast.lane.b32.xlu1 %v887_v33, 256  ;;  %v922_v44 = vsub.f32 0.0, %v917_v40  ;;  %v2034_v33 = vld [vmem:[%s2513_s24 + $0x4] sm:$0x3] }
 0xa31   : > { %v906_v63 = vpop.permute.xlu0 %905 }
 0xa32   : > { %912 = vbcast.lane.b32.xlu1 %v910_v27, 256 }
 0xa36   : > { %1114 = vrot.lane.b32.xlu1 %v801_v21, %s2469_s7 }
 0xa9c   : > { %v897_v36 = vpop.permute.xlu1 %896 }
 0xa9d   : > { %v899_v39 = vsub.f32 %v897_v36, %v2643_v6 }
 0xa9f   : > { %v925_v43 = vmul.f32 %v923_v38, %v899_v39 }
 0xaa0   : > { %v890_v56 = vpop.permute.xlu1 %889 }
 0xaa1   : > { %v927_v45 = vmul.f32 %v925_v43, %v899_v39  ;;  %v898_v46 = vsub.f32 %v890_v56, %v2643_v6 }
 0xaa3   : > { %v930_v47 = vmul.f32 1.442695, %v927_v45  ;;  %v924_v50 = vmul.f32 %v922_v44, %v898_v46 }
 0xaa4   : > { %v913_v55 = vpop.permute.xlu1 %912 }
 0xaa5   : > { %2421 = vpow2.f32 %v930_v47  ;;  %v926_v51 = vmul.f32 %v924_v50, %v898_v46 }
 0xaa7   : > { %v928_v53 = vmul.f32 1.442695, %v926_v51 }
 0xaa8   : > { %v1115_v27 = vpop.permute.xlu1 %1114 }
 0xaa9   : > { %2423 = vpow2.f32 %v928_v53 }
 0xaaf   : > { %v2422_v54 = vpop.eup %2421 }
 0xab0   : > { %v933_v58 = vmul.f32 %v2422_v54, %v913_v55 }
 0xab2   : > { %v941_v59 = vsel %vm510_vm10, %v933_v58, 0.0 }
 0xab3   : > { %v2424_v60 = vpop.eup %2423  ;;  %v942_v0 = vrot.slane %v941_v59, 4 }
 0xab4   : > { %v932_v2 = vmul.f32 %v2424_v60, %v906_v63 }
 0xab5   : > { %v943_v3 = vadd.f32 %v942_v0, %v941_v59 }
 0xab6   : > { %v934_v7 = vsel %vm510_vm10, %v932_v2, 0.0 }
 0xab7   : > { %v935_v9 = vrot.slane %v934_v7, 4  ;;  %v944_v11 = vrot.slane %v943_v3, 2 }
 0xab9   : > { %v945_v12 = vadd.f32 %v944_v11, %v943_v3  ;;  %v936_v14 = vadd.f32 %v935_v9, %v934_v7 }
 0xabb   : > { %v946_v15 = vrot.slane %v945_v12, 1  ;;  %v937_v16 = vrot.slane %v936_v14, 2 }
 0xabd   : > { %v947_v17 = vadd.f32 %v946_v15, %v945_v12  ;;  %v938_v19 = vadd.f32 %v937_v16, %v936_v14 }
 0xabf   : > { %2204 = vmatmul.mubr.msk.f32.vlgmr.msra.gmra.mrb[6].mxu1 %vm525_vm11, %v947_v17  ;;  %v939_v20 = vrot.slane %v938_v19, 1 }
 0xac0   : > { %2343 = vmatpush3.bf16.msra.mxu1 %v2576_v35  ;;  %2229 = vmatprep.mubr.msk.f32.mxu1 %vm2464_vm3, %v2465_v8 }
 0xac1   : > { %v940_v21 = vadd.f32 %v939_v20, %v938_v19  ;;  %2344 = vmatprep.subr.bf16.mxu1 %v2463_v4 }
 0xac3   : > { %2197 = vmatmul.mubr.msk.f32.vlgmr.msra.gmra.mrb[6].mxu0 %vm525_vm11, %v940_v21  ;;  %v2722_v31 = vsel %vm683_vm12, %v947_v17, %v940_v21 }
 0xac4   : > { %2334 = vmatpush3.bf16.msra.mxu0 %v2527_v5  ;;  %2218 = vmatprep.mubr.msk.f32.mxu0 %vm2464_vm3, %v2465_v8 }
 0xac5   : > { %2335 = vmatprep.subr.bf16.mxu0 %v2463_v4  ;;  %2346 = vmatpush3.bf16.msra.mxu1 %v2582_v37 }
 0xac6   : > { %2347 = vmatprep.subr.bf16.mxu1 %v2463_v4 }
 0xac8   : > { %2337 = vmatpush3.bf16.msra.mxu0 %v2539_v10 }
 0xac9   : > { %2338 = vmatprep.subr.bf16.mxu0 %v2463_v4 }
 0xacc   : > { %2340 = vmatpush3.bf16.msra.mxu0 %v2552_v13 }
 0xacd   : > { %2351 = vmatprep.subr.bf16.mxu0 %v2463_v4 }
 0xb92   : > { %v1090_v23 = vpop.f32.mrb[6].mxu1 }
 0xb93   : > { %v2205_v24 = vpop.f32.mrb[7].mxu1  ;;  %v1097_v25 = vrot.slane %v1090_v23, 7 }
 0xb96   : > { %v1017_v26 = vpop.f32.mrb[6].mxu0 }
 0xb97   : > { %v2735_v28 = vsel %vm683_vm12, %v1097_v25, %v1017_v26  ;;  %v2198_v29 = vpop.f32.mrb[7].mxu0 }
 0xb98   : > { %v1117_v32 = vsel %vm266_vm4, %v2735_v28, %v1115_v27 }
 0xb99   : > { %2219 = vmatmul.mubr.msk.f32.vlgmr.msra.gmra.mrb[8].mxu0 %vm268_vm5, %v1117_v32 }
 0xb9a   : > { %2354 = vmatpush3.bf16.msk.msra.mxu0 %vm2623_vm9, %v2621_v61  ;;  %2243 = vmatprep.mubr.msk.f32.mxu0 %vm2464_vm3, %v2465_v8 }
 0xb9b   : > { %2364 = vmatprep.subr.bf16.mxu0 %v2463_v4 }
 0xc6c   : > { %v1187_v34 = vpop.f32.mrb[8].mxu0 }
 0xc6d   : > { %v1191_v36 = vadd.f32 %v2034_v33, %v1187_v34  ;;  %v2220_v38 = vpop.f32.mrb[9].mxu0 }
 0xc6f   : > { %2425 = vtanh.f32 %v1191_v36  ;;  %v2036_v40 = vmul.f32 -1.442695, %v1191_v36 }
 0xc71   : > { %2427 = vpow2.f32 %v2036_v40 }
 0xc79   : > { %v2426_v39 = vpop.eup %2425 }
 0xc7a   : > { %1201 = vrot.lane.b32.xlu0 %v2426_v39, %s2467_s17 }
 0xc7b   : > { %v2428_v43 = vpop.eup %2427 }
 0xc7c   : > { %v1195_v56 = vadd.f32 1.0, %v2428_v43 }
 0xc7e   : > { %2429 = vrcp.f32 %v1195_v56 }
 0xc88   : > { %v2430_v44 = vpop.eup %2429 }
 0xc89   : > { %v1199_v47 = vmul.f32 %v2430_v44, %v2684_v18 }
 0xcec   : > { %v1202_v45 = vpop.permute.xlu0 %1201 }
 0xced   : > { %v1204_v46 = vmul.f32 %v2430_v44, %v1202_v45 }
 0xcef   : > { %1206 = vrot.lane.b32.xlu1 %v1204_v46, %s2466_s16 }
 0xd61   : > { %v1207_v50 = vpop.permute.xlu1 %1206 }
 0xd62   : > { %v2750_v51 = vadd.f32 %v1207_v50, %v1199_v47 }
 0xd64   : > { %2431 = vtanh.f32 %v2750_v51 }
 0xd6e   : > { %v2432_v53 = vpop.eup %2431 }
 0xd6f   : > { %1212 = vrot.lane.b32.xlu0 %v2432_v53, %s2467_s17 }
 0xde1   : > { %v1213_v54 = vpop.permute.xlu0 %1212 }
 0xde2   : > { %v1215_v55 = vmul.f32 %v2430_v44, %v1213_v54 }
 0xde4   : > { %1217 = vrot.lane.b32.xlu1 %v1215_v55, %s2466_s16 }
 0xe56   : > { %v2755_v58 = vpop.permute.xlu1 %1217 }
 0xe57   : > { %2230 = vmatmul.mubr.msk.f32.vlgmr.msra.gmra.mrb[8].mxu1 %vm380_vm6, %v2755_v58 }
 0xe58   : > { %2350 = vmatpush3.bf16.msk.msra.mxu1 %vm2623_vm9, %v2637_v1  ;;  %2236 = vmatprep.mubr.msk.f32.mxu1 %vm2464_vm3, %v2465_v8 }
 0xe59   : > { %2355 = vmatprep.subr.bf16.mxu1 %v2463_v4 }
 0xf2a   : > { %v1287_v18 = vpop.f32.mrb[8].mxu1 }
 0xf2b   : > { %v1288_v59 = vadd.f32 %v2598_v42, %v1287_v18  ;;  %v2231_v60 = vpop.f32.mrb[9].mxu1 }
 0xf2d   : > { %v1291_v63 = vmul.f32 1.442695, %v1288_v59 }
 0xf2f   : > { %2433 = vpow2.f32 %v1291_v63 }
 0xf39   : > { %v2434_v0 = vpop.eup %2433 }
 0xf3a   : > { %1294 = vrot.lane.b32.xlu0 %v2434_v0, %s2468_s6  ;;  %v1324_v2 = vrot.slane %v2434_v0, %v2601_v49  ;;  %v1317_v3 = vrot.slane %v2434_v0, %v2605_v52 }
 0xf3e   : > { %1334 = vbcast.lane.b32.xlu0 %v1324_v2, 260 }
 0xf42   : > { %1330 = vbcast.lane.b32.xlu0 %v1317_v3, 260 }
 0xf46   : > { %1319 = vbcast.lane.b32.xlu0 %v1317_v3, 256 }
 0xfac   : > { %v1295_v7 = vpop.permute.xlu0 %1294 }
 0xfad   : > { %v2770_v9 = vadd.f32 %v1295_v7, %v2704_v30 }
 0xfaf   : > { %v1308_v11 = vrot.slane %v2770_v9, %v2601_v49  ;;  %v1301_v12 = vrot.slane %v2770_v9, %v2605_v52 }
 0xfb0   : > { %v1335_v14 = vpop.permute.xlu0 %1334 }
 0xfb1   : > { %1310 = vbcast.lane.b32.xlu1 %v1308_v11, 256  ;;  %v1337_v16 = vsub.f32 0.0, %v1335_v14 }
 0xfb4   : > { %v1331_v19 = vpop.permute.xlu0 %1330 }
 0xfb5   : > { %1303 = vbcast.lane.b32.xlu1 %v1301_v12, 256  ;;  %v1336_v21 = vsub.f32 0.0, %v1331_v19 }
 0xfb8   : > { %v1320_v39 = vpop.permute.xlu0 %1319 }
 0xfb9   : > { %1326 = vbcast.lane.b32.xlu1 %v1324_v2, 256 }
 0xfbd   : > { %1528 = vrot.lane.b32.xlu1 %v1215_v55, %s2469_s7 }
0x1023   : > { %v1311_v15 = vpop.permute.xlu1 %1310 }
0x1024   : > { %v1313_v17 = vsub.f32 %v1311_v15, %v2643_v6 }
0x1026   : > { %v1339_v20 = vmul.f32 %v1337_v16, %v1313_v17 }
0x1027   : > { %v1304_v30 = vpop.permute.xlu1 %1303 }
0x1028   : > { %v1341_v23 = vmul.f32 %v1339_v20, %v1313_v17  ;;  %v1312_v24 = vsub.f32 %v1304_v30, %v2643_v6 }
0x102a   : > { %v1344_v25 = vmul.f32 1.442695, %v1341_v23  ;;  %v1338_v26 = vmul.f32 %v1336_v21, %v1312_v24 }
0x102b   : > { %v1327_v33 = vpop.permute.xlu1 %1326 }
0x102c   : > { %2435 = vpow2.f32 %v1344_v25  ;;  %v1340_v27 = vmul.f32 %v1338_v26, %v1312_v24 }
0x102e   : > { %v1342_v29 = vmul.f32 1.442695, %v1340_v27 }
0x102f   : > { %v1529_v3 = vpop.permute.xlu1 %1528 }
0x1030   : > { %2437 = vpow2.f32 %v1342_v29 }
0x1036   : > { %v2436_v32 = vpop.eup %2435 }
0x1037   : > { %v1347_v34 = vmul.f32 %v2436_v32, %v1327_v33 }
0x1039   : > { %v1355_v36 = vsel %vm510_vm10, %v1347_v34, 0.0 }
0x103a   : > { %v2438_v38 = vpop.eup %2437  ;;  %v1356_v40 = vrot.slane %v1355_v36, 4 }
0x103b   : > { %v1346_v43 = vmul.f32 %v2438_v38, %v1320_v39 }
0x103c   : > { %v1357_v56 = vadd.f32 %v1356_v40, %v1355_v36 }
0x103d   : > { %v1348_v44 = vsel %vm510_vm10, %v1346_v43, 0.0 }
0x103e   : > { %v1349_v45 = vrot.slane %v1348_v44, 4  ;;  %v1358_v46 = vrot.slane %v1357_v56, 2 }
0x1040   : > { %v1359_v47 = vadd.f32 %v1358_v46, %v1357_v56  ;;  %v1350_v50 = vadd.f32 %v1349_v45, %v1348_v44 }
0x1042   : > { %v1360_v53 = vrot.slane %v1359_v47, 1  ;;  %v1351_v54 = vrot.slane %v1350_v50, 2 }
0x1044   : > { %v1361_v55 = vadd.f32 %v1360_v53, %v1359_v47  ;;  %v1352_v18 = vadd.f32 %v1351_v54, %v1350_v50 }
0x1046   : > { %2244 = vmatmul.mubr.msk.f32.vlgmr.msra.gmra.mrb[10].mxu0 %vm525_vm11, %v1361_v55  ;;  %v1353_v59 = vrot.slane %v1352_v18, 1 }
0x1047   : > { %2366 = vmatpush3.bf16.msra.mxu0 %v2576_v35  ;;  %2269 = vmatprep.mubr.msk.f32.mxu0 %vm2464_vm3, %v2465_v8 }
0x1048   : > { %v1354_v60 = vadd.f32 %v1353_v59, %v1352_v18  ;;  %2367 = vmatprep.subr.bf16.mxu0 %v2463_v4 }
0x104a   : > { %2237 = vmatmul.mubr.msk.f32.vlgmr.msra.gmra.mrb[10].mxu1 %vm525_vm11, %v1354_v60  ;;  %v2788_v63 = vsel %vm683_vm12, %v1361_v55, %v1354_v60 }
0x104b   : > { %2357 = vmatpush3.bf16.msra.mxu1 %v2527_v5  ;;  %2258 = vmatprep.mubr.msk.f32.mxu1 %vm2464_vm3, %v2465_v8 }
0x104c   : > { %2358 = vmatprep.subr.bf16.mxu1 %v2463_v4  ;;  %2369 = vmatpush3.bf16.msra.mxu0 %v2582_v37 }
0x104d   : > { %2370 = vmatprep.subr.bf16.mxu0 %v2463_v4 }
0x104f   : > { %2360 = vmatpush3.bf16.msra.mxu1 %v2539_v10 }
0x1050   : > { %2361 = vmatprep.subr.bf16.mxu1 %v2463_v4 }
0x1053   : > { %2363 = vmatpush3.bf16.msra.mxu1 %v2552_v13 }
0x1054   : > { %2374 = vmatprep.subr.bf16.mxu1 %v2463_v4  ;;  %v2043_v4 = vld [vmem:[%s2513_s24 + $0x6] sm:$0x3]  ;;  %s2471_s24 = smov 96  }
0x1119   : > { %v1504_v35 = vpop.f32.mrb[10].mxu0 }
0x111a   : > { %v2245_v5 = vpop.f32.mrb[11].mxu0  ;;  %v1511_v0 = vrot.slane %v1504_v35, 7 }
0x111d   : > { %v1431_v2 = vpop.f32.mrb[10].mxu1 }
0x111e   : > { %v2801_v7 = vsel %vm683_vm12, %v1511_v0, %v1431_v2  ;;  %v2238_v37 = vpop.f32.mrb[11].mxu1 }
0x111f   : > { %v1531_v11 = vsel %vm266_vm4, %v2801_v7, %v1529_v3 }
0x1120   : > { %2259 = vmatmul.mubr.msk.f32.vlgmr.msra.gmra.mrb[12].mxu1 %vm268_vm5, %v1531_v11 }
0x1121   : > { %2377 = vmatpush3.bf16.msk.msra.mxu1 %vm2623_vm9, %v2621_v61  ;;  %2283 = vmatprep.mubr.msk.f32.mxu1 %vm2464_vm3, %v2465_v8 }
0x11f3   : > { %v1601_v10 = vpop.f32.mrb[12].mxu1 }
0x11f4   : > { %v1605_v13 = vadd.f32 %v2043_v4, %v1601_v10  ;;  %v2260_v12 = vpop.f32.mrb[13].mxu1 }
0x11f6   : > { %2439 = vtanh.f32 %v1605_v13  ;;  %v2045_v15 = vmul.f32 -1.442695, %v1605_v13 }
0x11f8   : > { %2441 = vpow2.f32 %v2045_v15 }
0x1200   : > { %v2440_v14 = vpop.eup %2439 }
0x1201   : > { %1615 = vrot.lane.b32.xlu0 %v2440_v14, %s2467_s17 }
0x1202   : > { %v2442_v16 = vpop.eup %2441 }
0x1203   : > { %v1609_v17 = vadd.f32 1.0, %v2442_v16 }
0x1205   : > { %2443 = vrcp.f32 %v1609_v17 }
0x120f   : > { %v2444_v19 = vpop.eup %2443 }
0x1210   : > { %v1613_v61 = vmul.f32 %v2444_v19, %v2750_v51 }
0x1273   : > { %v1616_v20 = vpop.permute.xlu0 %1615 }
0x1274   : > { %v1618_v30 = vmul.f32 %v2444_v19, %v1616_v20 }
0x1276   : > { %1620 = vrot.lane.b32.xlu1 %v1618_v30, %s2466_s16 }
0x12e8   : > { %v1621_v21 = vpop.permute.xlu1 %1620 }
0x12e9   : > { %v1623_v23 = vadd.f32 %v1621_v21, %v1613_v61 }
0x12eb   : > { %2445 = vtanh.f32 %v1623_v23 }
0x12f5   : > { %v2446_v24 = vpop.eup %2445 }
0x12f6   : > { %1626 = vrot.lane.b32.xlu0 %v2446_v24, %s2467_s17 }
0x1368   : > { %v1627_v25 = vpop.permute.xlu0 %1626 }
0x1369   : > { %v1629_v26 = vmul.f32 %v2444_v19, %v1627_v25 }
0x136b   : > { %1631 = vrot.lane.b32.xlu1 %v1629_v26, %s2466_s16 }
0x13dd   : > { %v2817_v27 = vpop.permute.xlu1 %1631 }
0x13de   : > { %1940 = vst.msk [vmem:[#allocation2] sm:$0x3] %vm1939_vm13, %v2817_v27  ;;  %2270 = vmatmul.mubr.msk.f32.vlgmr.msra.gmra.mrb[12].mxu0 %vm380_vm6, %v2817_v27 }
0x13df   : > { %2373 = vmatpush3.bf16.msk.msra.mxu0 %vm2623_vm9, %v2637_v1  ;;  %2276 = vmatprep.mubr.msk.f32.mxu0 %vm2464_vm3, %v2465_v8 }
0x14b1   : > { %v1701_v51 = vpop.f32.mrb[12].mxu0 }
0x14b2   : > { %v1702_v29 = vadd.f32 %v2598_v42, %v1701_v51  ;;  %v2271_v32 = vpop.f32.mrb[13].mxu0 }
0x14b4   : > { %v1705_v33 = vmul.f32 1.442695, %v1702_v29 }
0x14b6   : > { %2447 = vpow2.f32 %v1705_v33 }
0x14c0   : > { %v2448_v34 = vpop.eup %2447 }
0x14c1   : > { %1708 = vrot.lane.b32.xlu0 %v2448_v34, %s2468_s6  ;;  %v1738_v36 = vrot.slane %v2448_v34, %v2601_v49  ;;  %v1731_v38 = vrot.slane %v2448_v34, %v2605_v52 }
0x14c5   : > { %1748 = vbcast.lane.b32.xlu0 %v1738_v36, 260 }
0x14c9   : > { %1744 = vbcast.lane.b32.xlu0 %v1731_v38, 260 }
0x14cd   : > { %1733 = vbcast.lane.b32.xlu0 %v1731_v38, 256 }
0x14d1   : > { %1099 = vrot.lane.b32.xlu0 %v2735_v28, %s2466_s16 }
0x14d5   : > { %1103 = vrot.lane.b32.xlu0 %v2722_v31, %s2469_s7 }
0x1533   : > { %v1709_v8 = vpop.permute.xlu0 %1708 }
0x1534   : > { %v1711_v42 = vadd.f32 %v1709_v8, %v2770_v9 }
0x1536   : > { %1947 = vst.msk [vmem:[#allocation4] sm:$0x3] %vm1946_vm14, %v1711_v42  ;;  %v1722_v62 = vrot.slane %v1711_v42, %v2601_v49  ;;  %v1715_v39 = vrot.slane %v1711_v42, %v2605_v52 }
0x1537   : > { %v1749_v1 = vpop.permute.xlu0 %1748 }
0x1538   : > { %1724 = vbcast.lane.b32.xlu1 %v1722_v62, 256  ;;  %v1751_v56 = vsub.f32 0.0, %v1749_v1 }
0x153b   : > { %v1745_v40 = vpop.permute.xlu0 %1744 }
0x153c   : > { %1717 = vbcast.lane.b32.xlu1 %v1715_v39, 256  ;;  %v1750_v46 = vsub.f32 0.0, %v1745_v40 }
0x153f   : > { %v1734_v43 = vpop.permute.xlu0 %1733 }
0x1540   : > { %1740 = vbcast.lane.b32.xlu1 %v1738_v36, 256 }
0x1543   : > { %v1100_v28 = vpop.permute.xlu0 %1099 }
0x1544   : > { %685 = vrot.lane.b32.xlu1 %v2669_v57, %s2466_s16  ;;  %v1106_v31 = vsel %vm380_vm6, %v2689_v22, %v1100_v28 }
0x1547   : > { %v1104_v9 = vpop.permute.xlu0 %1103 }
0x1548   : > { %v1107_v49 = vsel %vm268_vm5, %v1106_v31, %v1104_v9  ;;  %1513 = vrot.lane.b32.xlu1 %v2801_v7, %s2466_s16 }
0x1549   : > { %v1108_v52 = vsel %vm694_vm15, %v1107_v49, 0.0 }
0x154a   : > { %2033 = vst [vmem:[%s2518_s27 + $0x2] sm:$0x3] %v1108_v52 }
0x154c   : > { %689 = vrot.lane.b32.xlu1 %v2656_v48, %s2469_s7 }
0x1550   : > { %1517 = vrot.lane.b32.xlu1 %v2788_v63, %s2469_s7 }
0x1554   : > { %1942 = vrot.lane.b32.xlu1 %v1623_v23, %s2471_s24 }
0x15aa   : > { %v1725_v57 = vpop.permute.xlu1 %1724 }
0x15ab   : > { %v1727_v22 = vsub.f32 %v1725_v57, %v2643_v6 }
0x15ad   : > { %v1753_v44 = vmul.f32 %v1751_v56, %v1727_v22 }
0x15ae   : > { %v1718_v45 = vpop.permute.xlu1 %1717 }
0x15af   : > { %v1755_v47 = vmul.f32 %v1753_v44, %v1727_v22  ;;  %v1726_v50 = vsub.f32 %v1718_v45, %v2643_v6 }
0x15b1   : > { %v1758_v53 = vmul.f32 1.442695, %v1755_v47  ;;  %v1752_v54 = vmul.f32 %v1750_v46, %v1726_v50 }
0x15b2   : > { %v1741_v55 = vpop.permute.xlu1 %1740 }
0x15b3   : > { %2449 = vpow2.f32 %v1758_v53  ;;  %v1754_v48 = vmul.f32 %v1752_v54, %v1726_v50 }
0x15b5   : > { %v1756_v18 = vmul.f32 1.442695, %v1754_v48 }
0x15b6   : > { %v686_v59 = vpop.permute.xlu1 %685 }
0x15b7   : > { %2451 = vpow2.f32 %v1756_v18  ;;  %v692_v5 = vsel %vm380_vm6, %v2589_v41, %v686_v59 }
0x15ba   : > { %v1514_v60 = vpop.permute.xlu1 %1513 }
0x15bb   : > { %v1520_v4 = vsel %vm380_vm6, %v2755_v58, %v1514_v60 }
0x15bd   : > { %v2450_v63 = vpop.eup %2449 }
0x15be   : > { %v1761_v35 = vmul.f32 %v2450_v63, %v1741_v55  ;;  %v690_v0 = vpop.permute.xlu1 %689 }
0x15bf   : > { %v693_v2 = vsel %vm268_vm5, %v692_v5, %v690_v0 }
0x15c0   : > { %v1769_v6 = vsel %vm510_vm10, %v1761_v35, 0.0  ;;  %v695_v3 = vsel %vm694_vm15, %v693_v2, 0.0 }
0x15c1   : > { %v2452_v7 = vpop.eup %2451  ;;  %v1770_v37 = vrot.slane %v1769_v6, 4  ;;  %696 = vst [vmem:[%s2518_s27] sm:$0x3] %v695_v3 }
0x15c2   : > { %v1760_v11 = vmul.f32 %v2452_v7, %v1734_v43  ;;  %v1518_v10 = vpop.permute.xlu1 %1517 }
0x15c3   : > { %v1771_v13 = vadd.f32 %v1770_v37, %v1769_v6  ;;  %v1521_v12 = vsel %vm268_vm5, %v1520_v4, %v1518_v10 }
0x15c4   : > { %v1762_v41 = vsel %vm510_vm10, %v1760_v11, 0.0  ;;  %v1522_v14 = vsel %vm694_vm15, %v1521_v12, 0.0 }
0x15c5   : > { %v1763_v15 = vrot.slane %v1762_v41, 4  ;;  %v1772_v16 = vrot.slane %v1771_v13, 2  ;;  %2042 = vst [vmem:[%s2518_s27 + $0x4] sm:$0x3] %v1522_v14 }
0x15c6   : > { %v1943_v17 = vpop.permute.xlu1 %1942 }
0x15c7   : > { %v1773_v19 = vadd.f32 %v1772_v16, %v1771_v13  ;;  %1945 = vst.msk [vmem:[#allocation3] sm:$0x3] %vm1939_vm13, %v1943_v17  ;;  %v1764_v20 = vadd.f32 %v1763_v15, %v1762_v41 }
0x15c9   : > { %v1774_v30 = vrot.slane %v1773_v19, 1  ;;  %v1765_v61 = vrot.slane %v1764_v20, 2 }
0x15cb   : > { %v1775_v21 = vadd.f32 %v1774_v30, %v1773_v19  ;;  %v1766_v58 = vadd.f32 %v1765_v61, %v1764_v20 }
0x15cd   : > { %2284 = vmatmul.mubr.msk.f32.vlgmr.msra.gmra.mrb[14].mxu1 %vm525_vm11, %v1775_v21  ;;  %v1767_v23 = vrot.slane %v1766_v58, 1 }
0x15cf   : > { %v1768_v24 = vadd.f32 %v1767_v23, %v1766_v58 }
0x15d1   : > { %2277 = vmatmul.mubr.msk.f32.vlgmr.msra.gmra.mrb[14].mxu0 %vm525_vm11, %v1768_v24  ;;  %v1930_v25 = vsel %vm683_vm12, %v1775_v21, %v1768_v24 }
0x16a0   : > { %v1918_v26 = vpop.f32.mrb[14].mxu1 }
0x16a1   : > { %v2285_v51 = vpop.f32.mrb[15].mxu1  ;;  %v1925_v29 = vrot.slane %v1918_v26, 7 }
0x16a4   : > { %v1845_v32 = vpop.f32.mrb[14].mxu0 }
0x16a5   : > { %v2278_v33 = vpop.f32.mrb[15].mxu0  ;;  %v1926_v34 = vsel %vm683_vm12, %v1925_v29, %v1845_v32 }
0x16a6   : > { %1927 = vrot.lane.b32.xlu0 %v1926_v34, %s2466_s16  ;;  %1950 = vst.msk [vmem:[#allocation5] sm:$0x3] %vm1949_vm0, %v1926_v34 }
0x16aa   : > { %1931 = vrot.lane.b32.xlu0 %v1930_v25, %s2469_s7 }
0x1718   : > { %v1928_v36 = vpop.permute.xlu0 %1927 }
0x1719   : > { %v1934_v38 = vsel %vm380_vm6, %v2817_v27, %v1928_v36 }
0x171c   : > { %v1932_v8 = vpop.permute.xlu0 %1931 }
0x171d   : > { %v1935_v42 = vsel %vm268_vm5, %v1934_v38, %v1932_v8 }
0x171e   : > { %v1936_v62 = vsel %vm694_vm15, %v1935_v42, 0.0 }
0x171f   : > { %2051 = vst [vmem:[%s2518_s27 + $0x6] sm:$0x3] %v1936_v62 }
0x1720 PF: > { %s15_s18 = sadd.s32 1, %s2459_s18  }
0x1721   : > { %p12_p5 = scmp.ge.s32.totalorder %s15_s18, 5  }
0x1723   :  { %14 = sbr.rel (!%p12_p5) target bundleno = 1 (0x1), region = 80 }

</bundles_post_ra>
